<compile_context>
chip_gen: v7x
topology: tpu7x:2x2x1
jax: 0.10.0
libtpu: 0.0.40
codegen_flags: <defaults>
</compile_context>

<pallas_src>
import functools

import numpy as np
import jax
import jax.numpy as jnp
from jax import lax
from jax.experimental import pallas as pl
from jax.experimental.pallas import tpu as pltpu


# ----------------------------------------------------------------------------
# Fused kernel: init (t == 0) + all diffusion steps (in-kernel loop) + write
# ----------------------------------------------------------------------------
def _ddrm_kernel(params_ref,                       # SMEM (6, T)
                 w_ref,                            # VMEM (C, C)
                 y_ref, mask_ref, noise_ref,       # VMEM (C,HW),(C,HW),(T,C,HW)
                 x_out_ref,                        # VMEM (C, HW)
                 *, C, T, sigma_noise, sigma0, etab):
    m = mask_ref[...]
    y = y_ref[...]
    w = w_ref[...]

    case = m > sigma_noise

    # ---- time-invariant per-pixel precompute (hoisted out of the t loop) ---
    m_safe = jnp.where(case, m, 1.0)
    y_bar = jnp.where(case, y / m_safe, y)                    # U_adjoint(y)/mask
    nsr = jnp.where(case, sigma_noise / m_safe, 0.0)
    inv_nsr = jnp.where(case, m * (1.0 / sigma_noise), 0.0)   # 1/nsr, no divide
    nsr_etab_sq = (nsr * etab) ** 2

    def channel_mix(xb, w_s):
        # 1x1-conv denoiser: out[c, :] = sum_k w_s[c, k] * xb[k, :]
        # broadcast-accumulate on the VPU (no sublane concat, no tiny MXU dot).
        acc = w_s[:, 0:1] * xb[0:1, :]
        for k in range(1, C):
            acc = acc + w_s[:, k:k + 1] * xb[k:k + 1, :]
        return acc

    # ------------------------------ t == 0 init -----------------------------
    mean0 = jnp.where(case, y_bar, 0.0)
    std0 = jnp.where(case,
                     jnp.sqrt(jnp.maximum(sigma0 ** 2 - nsr ** 2, 0.0)),
                     sigma0)
    x_bar0 = mean0 + std0 * noise_ref[0]
    den0 = params_ref[5, 0]                        # 1 / (1 + sigma_0)
    x0 = channel_mix(x_bar0, w * den0)             # denoiser(V(x_bar), sigma_0)

    # ----------------------- diffusion steps t = 1..T-1 ---------------------
    def body(t, carry):
        x, x_bar_prev = carry
        sigma_t = params_ref[0, t]
        sig_sq = params_ref[1, t]
        csig = params_ref[2, t]
        ratio = params_ref[3, t]                   # c * sigma_t / sigma_{t-1}
        eta_sig = params_ref[4, t]
        den = params_ref[5, t]

        x_bar = x                                  # V_adjoint(x), V = identity
        case2 = jnp.logical_and(case, sigma_t < nsr)
        case3 = jnp.logical_and(case, sigma_t >= nsr)

        mean_b = x_bar + ratio * (x_bar_prev - x_bar)
        mean2 = x_bar + (csig * inv_nsr) * (y_bar - x_bar)
        mean3 = (1.0 - etab) * x_bar + etab * y_bar
        mean = jnp.where(case3, mean3, jnp.where(case2, mean2, mean_b))

        std3 = jnp.sqrt(jnp.maximum(sig_sq - nsr_etab_sq, 0.0))
        std = jnp.where(case3, std3, eta_sig)

        new_xbar = mean + std * noise_ref[t]
        x_new = channel_mix(new_xbar, w * den)     # den_scale folded into w
        return (x_new, new_xbar)

    if T > 1:
        unroll = (T - 1) if (T - 1) <= 8 else 4
        x_final, _ = lax.fori_loop(1, T, body, (x0, x_bar0), unroll=unroll)
    else:
        x_final = x0

    x_out_ref[...] = x_final


# ----------------------------------------------------------------------------
# Wrapper: single pallas_call over grid (N,), T folded into the kernel
# ----------------------------------------------------------------------------
def ddrm_pallas(y, mask, noises, w, sigmas, sigma_noise, eta=0.85, etab=1.0):
    """y, mask: (N, C, HW); noises: (T, N, C, HW); w: (C, C)."""
    N, C, HW = y.shape
    T = len(sigmas)
    c = float(np.sqrt(1.0 - eta ** 2))

    # Per-step scalar schedule, shape (6, T): long axis last for cheap SMEM.
    sig = np.asarray(sigmas, dtype=np.float64)
    params = np.zeros((6, T), dtype=np.float32)
    params[0] = sig
    params[1] = sig ** 2
    params[2] = c * sig
    prev = np.where(sig[:-1] == 0.0, 1.0, sig[:-1])   # guard interior zeros
    params[3, 1:] = c * sig[1:] / prev
    params[4] = eta * sig
    params[5] = 1.0 / (1.0 + sig)
    params = jnp.asarray(params)

    # Per-batch noise slab (N, T, C, HW) so the kernel indexes noise_ref[t].
    # TODO(synk): for long schedules / large HW, stream noise per step
    # (pl.Buffered) instead of keeping the whole history VMEM-resident.
    noises_nt = jnp.transpose(noises, (1, 0, 2, 3))

    kernel = functools.partial(
        _ddrm_kernel, C=C, T=T,
        sigma_noise=float(sigma_noise), sigma0=float(sigmas[0]),
        etab=float(etab))

    smem_spec = pl.BlockSpec(memory_space=pltpu.MemorySpace.SMEM)
    w_spec = pl.BlockSpec((C, C), lambda n: (0, 0))
    tile = pl.BlockSpec((None, C, HW), lambda n: (n, 0, 0))
    noise_spec = pl.BlockSpec((None, T, C, HW), lambda n: (n, 0, 0, 0))

    return pl.pallas_call(
        kernel,
        out_shape=jax.ShapeDtypeStruct((N, C, HW), jnp.float32),
        grid=(N,),
        in_specs=[smem_spec, w_spec, tile, tile, noise_spec],
        out_specs=tile,
        compiler_params=pltpu.CompilerParams(
            dimension_semantics=("parallel",)),
    )(params, w, y, mask, noises_nt)


# ----------------------------------------------------------------------------
# Pure-JAX reference (mirrors the PyTorch forward with identity U/V)
# ----------------------------------------------------------------------------
def ddrm_reference(y, mask, noises, w, sigmas, sigma_noise, eta=0.85, etab=1.0):
    c = float(np.sqrt(1.0 - eta ** 2))
    sigma0 = float(sigmas[0])

    case = mask > sigma_noise
    m_safe = jnp.where(case, mask, 1.0)
    y_bar = jnp.where(case, y / m_safe, y)
    nsr = jnp.where(case, sigma_noise / m_safe, 0.0)
    mean = jnp.where(case, y_bar, 0.0)
    std = jnp.where(case, jnp.sqrt(jnp.maximum(sigma0 ** 2 - nsr ** 2, 0.0)),
                    sigma0)
    x_bar = mean + std * noises[0]
    x_bar_prev = x_bar
    x = jnp.einsum("ck,nkp->ncp", w, x_bar) / (1.0 + sigma0)

    for t in range(1, len(sigmas)):
        st, stm1 = float(sigmas[t]), float(sigmas[t - 1])
        x_bar = x
        case2 = jnp.logical_and(case, st < nsr)
        case3 = jnp.logical_and(case, st >= nsr)
        nsr_safe = jnp.where(case2, nsr, 1.0)
        mean = x_bar + c * st * (x_bar_prev - x_bar) / stm1
        mean = jnp.where(case2, x_bar + c * st * (y_bar - x_bar) / nsr_safe, mean)
        mean = jnp.where(case3, (1.0 - etab) * x_bar + etab * y_bar, mean)
        std = jnp.where(case3,
                        jnp.sqrt(jnp.maximum(st ** 2 - (nsr * etab) ** 2, 0.0)),
                        eta * st)
        x_bar = mean + std * noises[t]
        x_bar_prev = x_bar
        x = jnp.einsum("ck,nkp->ncp", w, x_bar) / (1.0 + st)
    return x


# ----------------------------------------------------------------------------
if __name__ == "__main__":
    N, C, H, W = 2, 4, 16, 16
    HW = H * W
    sigmas = np.linspace(1.0, 0.0, 8).astype(np.float32)
    sigma_noise = 0.1
    eta, etab = 0.85, 1.0

    key = jax.random.PRNGKey(0)
    k_y, k_m, k_n = jax.random.split(key, 3)

    y_nchw = jax.random.normal(k_y, (N, C, H, W), dtype=jnp.float32)
    # physics.mask (abs), tiled over batch as in the PyTorch code
    mask_single = jnp.abs(jax.random.normal(k_m, (1, C, H, W), dtype=jnp.float32))
    mask_nchw = jnp.concatenate([mask_single] * N, axis=0)
    # pre-drawn Gaussian noise for every diffusion step (randn_like in torch)
    noises_nchw = jax.random.normal(k_n, (len(sigmas), N, C, H, W),
                                    dtype=jnp.float32)

    # deterministic synthetic denoiser weight (1x1 conv, C x C)
    w_den = (0.9 * jnp.eye(C, dtype=jnp.float32)
             + 0.02 * jnp.arange(C * C, dtype=jnp.float32).reshape(C, C) / (C * C))

    # reshape NCHW -> (N, C, H*W) for the kernel
    y = y_nchw.reshape(N, C, HW)
    mask = mask_nchw.reshape(N, C, HW)
    noises = noises_nchw.reshape(len(sigmas), N, C, HW)

    out = jax.block_until_ready(
        ddrm_pallas(y, mask, noises, w_den, sigmas, sigma_noise, eta, etab))
    ref = jax.block_until_ready(
        ddrm_reference(y, mask, noises, w_den, sigmas, sigma_noise, eta, etab))

    assert out.shape == (N, C, HW)
    assert bool(jnp.all(jnp.isfinite(out)))
    np.testing.assert_allclose(np.asarray(out), np.asarray(ref),
                               rtol=2e-3, atol=2e-3)

    print("KERNEL_OK")
</pallas_src>

<mosaic_0001>
module attributes {stable_mosaic.version = 11 : i64} {
  func.func @_ddrm_kernel(%arg0: i32, %arg1: memref<6x8xf32, #tpu.memory_space<smem>>, %arg2: memref<4x4xf32, #tpu.memory_space<vmem>>, %arg3: memref<1x4x256xf32, #tpu.memory_space<vmem>>, %arg4: memref<1x4x256xf32, #tpu.memory_space<vmem>>, %arg5: memref<1x8x4x256xf32, #tpu.memory_space<vmem>>, %arg6: memref<1x4x256xf32, #tpu.memory_space<vmem>>) attributes {dimension_semantics = [#tpu.dimension_semantics<parallel>], iteration_bounds = array<i64: 2>, scalar_prefetch = 0 : i64, scratch_operands = 0 : i64, tpu.core_type = #tpu.core_type<tc>, window_params = [{transform_indices = @transform_0, window_bounds = array<i64: 6, 8>}, {pipeline_mode = #tpu.pipeline_mode<synchronous>, transform_indices = @transform_1, window_bounds = array<i64: 4, 4>}, {transform_indices = @transform_2, window_bounds = array<i64: 1, 4, 256>}, {transform_indices = @transform_3, window_bounds = array<i64: 1, 4, 256>}, {transform_indices = @transform_4, window_bounds = array<i64: 1, 8, 4, 256>}, {transform_indices = @transform_5, window_bounds = array<i64: 1, 4, 256>}]} {
    %c0 = arith.constant 0 : index
    %c0_0 = arith.constant 0 : index
    %c0_1 = arith.constant 0 : index
    %0 = vector.load %arg4[%c0, %c0_0, %c0_1] : memref<1x4x256xf32, #tpu.memory_space<vmem>>, vector<1x4x256xf32>
    %1 = vector.shape_cast %0 : vector<1x4x256xf32> to vector<4x256xf32>
    %c0_2 = arith.constant 0 : index
    %c0_3 = arith.constant 0 : index
    %c0_4 = arith.constant 0 : index
    %2 = vector.load %arg3[%c0_2, %c0_3, %c0_4] : memref<1x4x256xf32, #tpu.memory_space<vmem>>, vector<1x4x256xf32>
    %3 = vector.shape_cast %2 : vector<1x4x256xf32> to vector<4x256xf32>
    %c0_5 = arith.constant 0 : index
    %c0_6 = arith.constant 0 : index
    %4 = vector.load %arg2[%c0_5, %c0_6] : memref<4x4xf32, #tpu.memory_space<vmem>>, vector<4x4xf32>
    %cst = arith.constant 1.000000e-01 : f32
    %5 = vector.broadcast %cst : f32 to vector<4x256xf32>
    %6 = arith.cmpf ogt, %1, %5 : vector<4x256xf32>
    %cst_7 = arith.constant 1.000000e+00 : f32
    %7 = vector.broadcast %cst_7 : f32 to vector<4x256xf32>
    %8 = arith.select %6, %1, %7 : vector<4x256xi1>, vector<4x256xf32>
    %9 = arith.divf %3, %8 : vector<4x256xf32>
    %10 = arith.select %6, %9, %3 : vector<4x256xi1>, vector<4x256xf32>
    %cst_8 = arith.constant 1.000000e-01 : f32
    %11 = vector.broadcast %cst_8 : f32 to vector<4x256xf32>
    %12 = arith.divf %11, %8 : vector<4x256xf32>
    %cst_9 = arith.constant 0.000000e+00 : f32
    %13 = vector.broadcast %cst_9 : f32 to vector<4x256xf32>
    %14 = arith.select %6, %12, %13 : vector<4x256xi1>, vector<4x256xf32>
    %cst_10 = arith.constant 1.000000e+01 : f32
    %15 = vector.broadcast %cst_10 : f32 to vector<4x256xf32>
    %16 = arith.mulf %1, %15 : vector<4x256xf32>
    %cst_11 = arith.constant 0.000000e+00 : f32
    %17 = vector.broadcast %cst_11 : f32 to vector<4x256xf32>
    %18 = arith.select %6, %16, %17 : vector<4x256xi1>, vector<4x256xf32>
    %cst_12 = arith.constant 1.000000e+00 : f32
    %19 = vector.broadcast %cst_12 : f32 to vector<4x256xf32>
    %20 = arith.mulf %14, %19 : vector<4x256xf32>
    %21 = arith.mulf %20, %20 : vector<4x256xf32>
    %cst_13 = arith.constant 0.000000e+00 : f32
    %22 = vector.broadcast %cst_13 : f32 to vector<4x256xf32>
    %23 = arith.select %6, %10, %22 : vector<4x256xi1>, vector<4x256xf32>
    %24 = arith.mulf %14, %14 : vector<4x256xf32>
    %cst_14 = arith.constant 1.000000e+00 : f32
    %25 = vector.broadcast %cst_14 : f32 to vector<4x256xf32>
    %26 = arith.subf %25, %24 : vector<4x256xf32>
    %cst_15 = arith.constant 0.000000e+00 : f32
    %27 = vector.broadcast %cst_15 : f32 to vector<4x256xf32>
    %28 = arith.maximumf %26, %27 : vector<4x256xf32>
    %29 = math.sqrt %28 : vector<4x256xf32>
    %cst_16 = arith.constant 1.000000e+00 : f32
    %30 = vector.broadcast %cst_16 : f32 to vector<4x256xf32>
    %31 = arith.select %6, %29, %30 : vector<4x256xi1>, vector<4x256xf32>
    %c0_17 = arith.constant 0 : index
    %c0_18 = arith.constant 0 : index
    %c0_19 = arith.constant 0 : index
    %c0_20 = arith.constant 0 : index
    %32 = vector.load %arg5[%c0_17, %c0_18, %c0_19, %c0_20] : memref<1x8x4x256xf32, #tpu.memory_space<vmem>>, vector<1x1x4x256xf32>
    %33 = vector.shape_cast %32 : vector<1x1x4x256xf32> to vector<4x256xf32>
    %34 = arith.mulf %31, %33 : vector<4x256xf32>
    %35 = arith.addf %23, %34 : vector<4x256xf32>
    %c5 = arith.constant 5 : index
    %c0_21 = arith.constant 0 : index
    %36 = memref.load %arg1[%c5, %c0_21] : memref<6x8xf32, #tpu.memory_space<smem>>
    %37 = vector.broadcast %36 : f32 to vector<4x4xf32>
    %38 = arith.mulf %4, %37 : vector<4x4xf32>
    %39 = vector.extract_strided_slice %38 {offsets = [0, 0], sizes = [4, 1], strides = [1, 1]} : vector<4x4xf32> to vector<4x1xf32>
    %40 = vector.extract_strided_slice %35 {offsets = [0, 0], sizes = [1, 256], strides = [1, 1]} : vector<4x256xf32> to vector<1x256xf32>
    %41 = vector.broadcast %39 : vector<4x1xf32> to vector<4x256xf32>
    %42 = vector.broadcast %40 : vector<1x256xf32> to vector<4x256xf32>
    %43 = arith.mulf %41, %42 : vector<4x256xf32>
    %44 = vector.extract_strided_slice %38 {offsets = [0, 1], sizes = [4, 1], strides = [1, 1]} : vector<4x4xf32> to vector<4x1xf32>
    %45 = vector.extract_strided_slice %35 {offsets = [1, 0], sizes = [1, 256], strides = [1, 1]} : vector<4x256xf32> to vector<1x256xf32>
    %46 = vector.broadcast %44 : vector<4x1xf32> to vector<4x256xf32>
    %47 = vector.broadcast %45 : vector<1x256xf32> to vector<4x256xf32>
    %48 = arith.mulf %46, %47 : vector<4x256xf32>
    %49 = arith.addf %43, %48 : vector<4x256xf32>
    %50 = vector.extract_strided_slice %38 {offsets = [0, 2], sizes = [4, 1], strides = [1, 1]} : vector<4x4xf32> to vector<4x1xf32>
    %51 = vector.extract_strided_slice %35 {offsets = [2, 0], sizes = [1, 256], strides = [1, 1]} : vector<4x256xf32> to vector<1x256xf32>
    %52 = vector.broadcast %50 : vector<4x1xf32> to vector<4x256xf32>
    %53 = vector.broadcast %51 : vector<1x256xf32> to vector<4x256xf32>
    %54 = arith.mulf %52, %53 : vector<4x256xf32>
    %55 = arith.addf %49, %54 : vector<4x256xf32>
    %56 = vector.extract_strided_slice %38 {offsets = [0, 3], sizes = [4, 1], strides = [1, 1]} : vector<4x4xf32> to vector<4x1xf32>
    %57 = vector.extract_strided_slice %35 {offsets = [3, 0], sizes = [1, 256], strides = [1, 1]} : vector<4x256xf32> to vector<1x256xf32>
    %58 = vector.broadcast %56 : vector<4x1xf32> to vector<4x256xf32>
    %59 = vector.broadcast %57 : vector<1x256xf32> to vector<4x256xf32>
    %60 = arith.mulf %58, %59 : vector<4x256xf32>
    %61 = arith.addf %55, %60 : vector<4x256xf32>
    %c1_i32 = arith.constant 1 : i32
    %c0_22 = arith.constant 0 : index
    %62 = arith.index_cast %c1_i32 : i32 to index
    %63 = memref.load %arg1[%c0_22, %62] : memref<6x8xf32, #tpu.memory_space<smem>>
    %c1 = arith.constant 1 : index
    %64 = arith.index_cast %c1_i32 : i32 to index
    %65 = memref.load %arg1[%c1, %64] : memref<6x8xf32, #tpu.memory_space<smem>>
    %c2 = arith.constant 2 : index
    %66 = arith.index_cast %c1_i32 : i32 to index
    %67 = memref.load %arg1[%c2, %66] : memref<6x8xf32, #tpu.memory_space<smem>>
    %c3 = arith.constant 3 : index
    %68 = arith.index_cast %c1_i32 : i32 to index
    %69 = memref.load %arg1[%c3, %68] : memref<6x8xf32, #tpu.memory_space<smem>>
    %c4 = arith.constant 4 : index
    %70 = arith.index_cast %c1_i32 : i32 to index
    %71 = memref.load %arg1[%c4, %70] : memref<6x8xf32, #tpu.memory_space<smem>>
    %c5_23 = arith.constant 5 : index
    %72 = arith.index_cast %c1_i32 : i32 to index
    %73 = memref.load %arg1[%c5_23, %72] : memref<6x8xf32, #tpu.memory_space<smem>>
    %74 = vector.broadcast %63 : f32 to vector<4x256xf32>
    %75 = arith.cmpf olt, %74, %14 : vector<4x256xf32>
    %76 = arith.andi %6, %75 : vector<4x256xi1>
    %77 = vector.broadcast %63 : f32 to vector<4x256xf32>
    %78 = arith.cmpf oge, %77, %14 : vector<4x256xf32>
    %79 = arith.andi %6, %78 : vector<4x256xi1>
    %80 = arith.subf %35, %61 : vector<4x256xf32>
    %81 = vector.broadcast %69 : f32 to vector<4x256xf32>
    %82 = arith.mulf %81, %80 : vector<4x256xf32>
    %83 = arith.addf %61, %82 : vector<4x256xf32>
    %84 = vector.broadcast %67 : f32 to vector<4x256xf32>
    %85 = arith.mulf %84, %18 : vector<4x256xf32>
    %86 = arith.subf %10, %61 : vector<4x256xf32>
    %87 = arith.mulf %85, %86 : vector<4x256xf32>
    %88 = arith.addf %61, %87 : vector<4x256xf32>
    %cst_24 = arith.constant 0.000000e+00 : f32
    %89 = vector.broadcast %cst_24 : f32 to vector<4x256xf32>
    %90 = arith.mulf %89, %61 : vector<4x256xf32>
    %cst_25 = arith.constant 1.000000e+00 : f32
    %91 = vector.broadcast %cst_25 : f32 to vector<4x256xf32>
    %92 = arith.mulf %91, %10 : vector<4x256xf32>
    %93 = arith.addf %90, %92 : vector<4x256xf32>
    %94 = arith.select %76, %88, %83 : vector<4x256xi1>, vector<4x256xf32>
    %95 = arith.select %79, %93, %94 : vector<4x256xi1>, vector<4x256xf32>
    %96 = vector.broadcast %65 : f32 to vector<4x256xf32>
    %97 = arith.subf %96, %21 : vector<4x256xf32>
    %cst_26 = arith.constant 0.000000e+00 : f32
    %98 = vector.broadcast %cst_26 : f32 to vector<4x256xf32>
    %99 = arith.maximumf %97, %98 : vector<4x256xf32>
    %100 = math.sqrt %99 : vector<4x256xf32>
    %101 = vector.broadcast %71 : f32 to vector<4x256xf32>
    %102 = arith.select %79, %100, %101 : vector<4x256xi1>, vector<4x256xf32>
    %c0_27 = arith.constant 0 : index
    %103 = arith.index_cast %c1_i32 : i32 to index
    %c0_28 = arith.constant 0 : index
    %c0_29 = arith.constant 0 : index
    %104 = vector.load %arg5[%c0_27, %103, %c0_28, %c0_29] : memref<1x8x4x256xf32, #tpu.memory_space<vmem>>, vector<1x1x4x256xf32>
    %105 = vector.shape_cast %104 : vector<1x1x4x256xf32> to vector<4x256xf32>
    %106 = arith.mulf %102, %105 : vector<4x256xf32>
    %107 = arith.addf %95, %106 : vector<4x256xf32>
    %108 = vector.broadcast %73 : f32 to vector<4x4xf32>
    %109 = arith.mulf %4, %108 : vector<4x4xf32>
    %110 = vector.extract_strided_slice %109 {offsets = [0, 0], sizes = [4, 1], strides = [1, 1]} : vector<4x4xf32> to vector<4x1xf32>
    %111 = vector.extract_strided_slice %107 {offsets = [0, 0], sizes = [1, 256], strides = [1, 1]} : vector<4x256xf32> to vector<1x256xf32>
    %112 = vector.broadcast %110 : vector<4x1xf32> to vector<4x256xf32>
    %113 = vector.broadcast %111 : vector<1x256xf32> to vector<4x256xf32>
    %114 = arith.mulf %112, %113 : vector<4x256xf32>
    %115 = vector.extract_strided_slice %109 {offsets = [0, 1], sizes = [4, 1], strides = [1, 1]} : vector<4x4xf32> to vector<4x1xf32>
    %116 = vector.extract_strided_slice %107 {offsets = [1, 0], sizes = [1, 256], strides = [1, 1]} : vector<4x256xf32> to vector<1x256xf32>
    %117 = vector.broadcast %115 : vector<4x1xf32> to vector<4x256xf32>
    %118 = vector.broadcast %116 : vector<1x256xf32> to vector<4x256xf32>
    %119 = arith.mulf %117, %118 : vector<4x256xf32>
    %120 = arith.addf %114, %119 : vector<4x256xf32>
    %121 = vector.extract_strided_slice %109 {offsets = [0, 2], sizes = [4, 1], strides = [1, 1]} : vector<4x4xf32> to vector<4x1xf32>
    %122 = vector.extract_strided_slice %107 {offsets = [2, 0], sizes = [1, 256], strides = [1, 1]} : vector<4x256xf32> to vector<1x256xf32>
    %123 = vector.broadcast %121 : vector<4x1xf32> to vector<4x256xf32>
    %124 = vector.broadcast %122 : vector<1x256xf32> to vector<4x256xf32>
    %125 = arith.mulf %123, %124 : vector<4x256xf32>
    %126 = arith.addf %120, %125 : vector<4x256xf32>
    %127 = vector.extract_strided_slice %109 {offsets = [0, 3], sizes = [4, 1], strides = [1, 1]} : vector<4x4xf32> to vector<4x1xf32>
    %128 = vector.extract_strided_slice %107 {offsets = [3, 0], sizes = [1, 256], strides = [1, 1]} : vector<4x256xf32> to vector<1x256xf32>
    %129 = vector.broadcast %127 : vector<4x1xf32> to vector<4x256xf32>
    %130 = vector.broadcast %128 : vector<1x256xf32> to vector<4x256xf32>
    %131 = arith.mulf %129, %130 : vector<4x256xf32>
    %132 = arith.addf %126, %131 : vector<4x256xf32>
    %c2_i32 = arith.constant 2 : i32
    %c0_30 = arith.constant 0 : index
    %133 = arith.index_cast %c2_i32 : i32 to index
    %134 = memref.load %arg1[%c0_30, %133] : memref<6x8xf32, #tpu.memory_space<smem>>
    %c1_31 = arith.constant 1 : index
    %135 = arith.index_cast %c2_i32 : i32 to index
    %136 = memref.load %arg1[%c1_31, %135] : memref<6x8xf32, #tpu.memory_space<smem>>
    %c2_32 = arith.constant 2 : index
    %137 = arith.index_cast %c2_i32 : i32 to index
    %138 = memref.load %arg1[%c2_32, %137] : memref<6x8xf32, #tpu.memory_space<smem>>
    %c3_33 = arith.constant 3 : index
    %139 = arith.index_cast %c2_i32 : i32 to index
    %140 = memref.load %arg1[%c3_33, %139] : memref<6x8xf32, #tpu.memory_space<smem>>
    %c4_34 = arith.constant 4 : index
    %141 = arith.index_cast %c2_i32 : i32 to index
    %142 = memref.load %arg1[%c4_34, %141] : memref<6x8xf32, #tpu.memory_space<smem>>
    %c5_35 = arith.constant 5 : index
    %143 = arith.index_cast %c2_i32 : i32 to index
    %144 = memref.load %arg1[%c5_35, %143] : memref<6x8xf32, #tpu.memory_space<smem>>
    %145 = vector.broadcast %134 : f32 to vector<4x256xf32>
    %146 = arith.cmpf olt, %145, %14 : vector<4x256xf32>
    %147 = arith.andi %6, %146 : vector<4x256xi1>
    %148 = vector.broadcast %134 : f32 to vector<4x256xf32>
    %149 = arith.cmpf oge, %148, %14 : vector<4x256xf32>
    %150 = arith.andi %6, %149 : vector<4x256xi1>
    %151 = arith.subf %107, %132 : vector<4x256xf32>
    %152 = vector.broadcast %140 : f32 to vector<4x256xf32>
    %153 = arith.mulf %152, %151 : vector<4x256xf32>
    %154 = arith.addf %132, %153 : vector<4x256xf32>
    %155 = vector.broadcast %138 : f32 to vector<4x256xf32>
    %156 = arith.mulf %155, %18 : vector<4x256xf32>
    %157 = arith.subf %10, %132 : vector<4x256xf32>
    %158 = arith.mulf %156, %157 : vector<4x256xf32>
    %159 = arith.addf %132, %158 : vector<4x256xf32>
    %cst_36 = arith.constant 0.000000e+00 : f32
    %160 = vector.broadcast %cst_36 : f32 to vector<4x256xf32>
    %161 = arith.mulf %160, %132 : vector<4x256xf32>
    %cst_37 = arith.constant 1.000000e+00 : f32
    %162 = vector.broadcast %cst_37 : f32 to vector<4x256xf32>
    %163 = arith.mulf %162, %10 : vector<4x256xf32>
    %164 = arith.addf %161, %163 : vector<4x256xf32>
    %165 = arith.select %147, %159, %154 : vector<4x256xi1>, vector<4x256xf32>
    %166 = arith.select %150, %164, %165 : vector<4x256xi1>, vector<4x256xf32>
    %167 = vector.broadcast %136 : f32 to vector<4x256xf32>
    %168 = arith.subf %167, %21 : vector<4x256xf32>
    %cst_38 = arith.constant 0.000000e+00 : f32
    %169 = vector.broadcast %cst_38 : f32 to vector<4x256xf32>
    %170 = arith.maximumf %168, %169 : vector<4x256xf32>
    %171 = math.sqrt %170 : vector<4x256xf32>
    %172 = vector.broadcast %142 : f32 to vector<4x256xf32>
    %173 = arith.select %150, %171, %172 : vector<4x256xi1>, vector<4x256xf32>
    %c0_39 = arith.constant 0 : index
    %174 = arith.index_cast %c2_i32 : i32 to index
    %c0_40 = arith.constant 0 : index
    %c0_41 = arith.constant 0 : index
    %175 = vector.load %arg5[%c0_39, %174, %c0_40, %c0_41] : memref<1x8x4x256xf32, #tpu.memory_space<vmem>>, vector<1x1x4x256xf32>
    %176 = vector.shape_cast %175 : vector<1x1x4x256xf32> to vector<4x256xf32>
    %177 = arith.mulf %173, %176 : vector<4x256xf32>
    %178 = arith.addf %166, %177 : vector<4x256xf32>
    %179 = vector.broadcast %144 : f32 to vector<4x4xf32>
    %180 = arith.mulf %4, %179 : vector<4x4xf32>
    %181 = vector.extract_strided_slice %180 {offsets = [0, 0], sizes = [4, 1], strides = [1, 1]} : vector<4x4xf32> to vector<4x1xf32>
    %182 = vector.extract_strided_slice %178 {offsets = [0, 0], sizes = [1, 256], strides = [1, 1]} : vector<4x256xf32> to vector<1x256xf32>
    %183 = vector.broadcast %181 : vector<4x1xf32> to vector<4x256xf32>
    %184 = vector.broadcast %182 : vector<1x256xf32> to vector<4x256xf32>
    %185 = arith.mulf %183, %184 : vector<4x256xf32>
    %186 = vector.extract_strided_slice %180 {offsets = [0, 1], sizes = [4, 1], strides = [1, 1]} : vector<4x4xf32> to vector<4x1xf32>
    %187 = vector.extract_strided_slice %178 {offsets = [1, 0], sizes = [1, 256], strides = [1, 1]} : vector<4x256xf32> to vector<1x256xf32>
    %188 = vector.broadcast %186 : vector<4x1xf32> to vector<4x256xf32>
    %189 = vector.broadcast %187 : vector<1x256xf32> to vector<4x256xf32>
    %190 = arith.mulf %188, %189 : vector<4x256xf32>
    %191 = arith.addf %185, %190 : vector<4x256xf32>
    %192 = vector.extract_strided_slice %180 {offsets = [0, 2], sizes = [4, 1], strides = [1, 1]} : vector<4x4xf32> to vector<4x1xf32>
    %193 = vector.extract_strided_slice %178 {offsets = [2, 0], sizes = [1, 256], strides = [1, 1]} : vector<4x256xf32> to vector<1x256xf32>
    %194 = vector.broadcast %192 : vector<4x1xf32> to vector<4x256xf32>
    %195 = vector.broadcast %193 : vector<1x256xf32> to vector<4x256xf32>
    %196 = arith.mulf %194, %195 : vector<4x256xf32>
    %197 = arith.addf %191, %196 : vector<4x256xf32>
    %198 = vector.extract_strided_slice %180 {offsets = [0, 3], sizes = [4, 1], strides = [1, 1]} : vector<4x4xf32> to vector<4x1xf32>
    %199 = vector.extract_strided_slice %178 {offsets = [3, 0], sizes = [1, 256], strides = [1, 1]} : vector<4x256xf32> to vector<1x256xf32>
    %200 = vector.broadcast %198 : vector<4x1xf32> to vector<4x256xf32>
    %201 = vector.broadcast %199 : vector<1x256xf32> to vector<4x256xf32>
    %202 = arith.mulf %200, %201 : vector<4x256xf32>
    %203 = arith.addf %197, %202 : vector<4x256xf32>
    %c3_i32 = arith.constant 3 : i32
    %c0_42 = arith.constant 0 : index
    %204 = arith.index_cast %c3_i32 : i32 to index
    %205 = memref.load %arg1[%c0_42, %204] : memref<6x8xf32, #tpu.memory_space<smem>>
    %c1_43 = arith.constant 1 : index
    %206 = arith.index_cast %c3_i32 : i32 to index
    %207 = memref.load %arg1[%c1_43, %206] : memref<6x8xf32, #tpu.memory_space<smem>>
    %c2_44 = arith.constant 2 : index
    %208 = arith.index_cast %c3_i32 : i32 to index
    %209 = memref.load %arg1[%c2_44, %208] : memref<6x8xf32, #tpu.memory_space<smem>>
    %c3_45 = arith.constant 3 : index
    %210 = arith.index_cast %c3_i32 : i32 to index
    %211 = memref.load %arg1[%c3_45, %210] : memref<6x8xf32, #tpu.memory_space<smem>>
    %c4_46 = arith.constant 4 : index
    %212 = arith.index_cast %c3_i32 : i32 to index
    %213 = memref.load %arg1[%c4_46, %212] : memref<6x8xf32, #tpu.memory_space<smem>>
    %c5_47 = arith.constant 5 : index
    %214 = arith.index_cast %c3_i32 : i32 to index
    %215 = memref.load %arg1[%c5_47, %214] : memref<6x8xf32, #tpu.memory_space<smem>>
    %216 = vector.broadcast %205 : f32 to vector<4x256xf32>
    %217 = arith.cmpf olt, %216, %14 : vector<4x256xf32>
    %218 = arith.andi %6, %217 : vector<4x256xi1>
    %219 = vector.broadcast %205 : f32 to vector<4x256xf32>
    %220 = arith.cmpf oge, %219, %14 : vector<4x256xf32>
    %221 = arith.andi %6, %220 : vector<4x256xi1>
    %222 = arith.subf %178, %203 : vector<4x256xf32>
    %223 = vector.broadcast %211 : f32 to vector<4x256xf32>
    %224 = arith.mulf %223, %222 : vector<4x256xf32>
    %225 = arith.addf %203, %224 : vector<4x256xf32>
    %226 = vector.broadcast %209 : f32 to vector<4x256xf32>
    %227 = arith.mulf %226, %18 : vector<4x256xf32>
    %228 = arith.subf %10, %203 : vector<4x256xf32>
    %229 = arith.mulf %227, %228 : vector<4x256xf32>
    %230 = arith.addf %203, %229 : vector<4x256xf32>
    %cst_48 = arith.constant 0.000000e+00 : f32
    %231 = vector.broadcast %cst_48 : f32 to vector<4x256xf32>
    %232 = arith.mulf %231, %203 : vector<4x256xf32>
    %cst_49 = arith.constant 1.000000e+00 : f32
    %233 = vector.broadcast %cst_49 : f32 to vector<4x256xf32>
    %234 = arith.mulf %233, %10 : vector<4x256xf32>
    %235 = arith.addf %232, %234 : vector<4x256xf32>
    %236 = arith.select %218, %230, %225 : vector<4x256xi1>, vector<4x256xf32>
    %237 = arith.select %221, %235, %236 : vector<4x256xi1>, vector<4x256xf32>
    %238 = vector.broadcast %207 : f32 to vector<4x256xf32>
    %239 = arith.subf %238, %21 : vector<4x256xf32>
    %cst_50 = arith.constant 0.000000e+00 : f32
    %240 = vector.broadcast %cst_50 : f32 to vector<4x256xf32>
    %241 = arith.maximumf %239, %240 : vector<4x256xf32>
    %242 = math.sqrt %241 : vector<4x256xf32>
    %243 = vector.broadcast %213 : f32 to vector<4x256xf32>
    %244 = arith.select %221, %242, %243 : vector<4x256xi1>, vector<4x256xf32>
    %c0_51 = arith.constant 0 : index
    %245 = arith.index_cast %c3_i32 : i32 to index
    %c0_52 = arith.constant 0 : index
    %c0_53 = arith.constant 0 : index
    %246 = vector.load %arg5[%c0_51, %245, %c0_52, %c0_53] : memref<1x8x4x256xf32, #tpu.memory_space<vmem>>, vector<1x1x4x256xf32>
    %247 = vector.shape_cast %246 : vector<1x1x4x256xf32> to vector<4x256xf32>
    %248 = arith.mulf %244, %247 : vector<4x256xf32>
    %249 = arith.addf %237, %248 : vector<4x256xf32>
    %250 = vector.broadcast %215 : f32 to vector<4x4xf32>
    %251 = arith.mulf %4, %250 : vector<4x4xf32>
    %252 = vector.extract_strided_slice %251 {offsets = [0, 0], sizes = [4, 1], strides = [1, 1]} : vector<4x4xf32> to vector<4x1xf32>
    %253 = vector.extract_strided_slice %249 {offsets = [0, 0], sizes = [1, 256], strides = [1, 1]} : vector<4x256xf32> to vector<1x256xf32>
    %254 = vector.broadcast %252 : vector<4x1xf32> to vector<4x256xf32>
    %255 = vector.broadcast %253 : vector<1x256xf32> to vector<4x256xf32>
    %256 = arith.mulf %254, %255 : vector<4x256xf32>
    %257 = vector.extract_strided_slice %251 {offsets = [0, 1], sizes = [4, 1], strides = [1, 1]} : vector<4x4xf32> to vector<4x1xf32>
    %258 = vector.extract_strided_slice %249 {offsets = [1, 0], sizes = [1, 256], strides = [1, 1]} : vector<4x256xf32> to vector<1x256xf32>
    %259 = vector.broadcast %257 : vector<4x1xf32> to vector<4x256xf32>
    %260 = vector.broadcast %258 : vector<1x256xf32> to vector<4x256xf32>
    %261 = arith.mulf %259, %260 : vector<4x256xf32>
    %262 = arith.addf %256, %261 : vector<4x256xf32>
    %263 = vector.extract_strided_slice %251 {offsets = [0, 2], sizes = [4, 1], strides = [1, 1]} : vector<4x4xf32> to vector<4x1xf32>
    %264 = vector.extract_strided_slice %249 {offsets = [2, 0], sizes = [1, 256], strides = [1, 1]} : vector<4x256xf32> to vector<1x256xf32>
    %265 = vector.broadcast %263 : vector<4x1xf32> to vector<4x256xf32>
    %266 = vector.broadcast %264 : vector<1x256xf32> to vector<4x256xf32>
    %267 = arith.mulf %265, %266 : vector<4x256xf32>
    %268 = arith.addf %262, %267 : vector<4x256xf32>
    %269 = vector.extract_strided_slice %251 {offsets = [0, 3], sizes = [4, 1], strides = [1, 1]} : vector<4x4xf32> to vector<4x1xf32>
    %270 = vector.extract_strided_slice %249 {offsets = [3, 0], sizes = [1, 256], strides = [1, 1]} : vector<4x256xf32> to vector<1x256xf32>
    %271 = vector.broadcast %269 : vector<4x1xf32> to vector<4x256xf32>
    %272 = vector.broadcast %270 : vector<1x256xf32> to vector<4x256xf32>
    %273 = arith.mulf %271, %272 : vector<4x256xf32>
    %274 = arith.addf %268, %273 : vector<4x256xf32>
    %c4_i32 = arith.constant 4 : i32
    %c0_54 = arith.constant 0 : index
    %275 = arith.index_cast %c4_i32 : i32 to index
    %276 = memref.load %arg1[%c0_54, %275] : memref<6x8xf32, #tpu.memory_space<smem>>
    %c1_55 = arith.constant 1 : index
    %277 = arith.index_cast %c4_i32 : i32 to index
    %278 = memref.load %arg1[%c1_55, %277] : memref<6x8xf32, #tpu.memory_space<smem>>
    %c2_56 = arith.constant 2 : index
    %279 = arith.index_cast %c4_i32 : i32 to index
    %280 = memref.load %arg1[%c2_56, %279] : memref<6x8xf32, #tpu.memory_space<smem>>
    %c3_57 = arith.constant 3 : index
    %281 = arith.index_cast %c4_i32 : i32 to index
    %282 = memref.load %arg1[%c3_57, %281] : memref<6x8xf32, #tpu.memory_space<smem>>
    %c4_58 = arith.constant 4 : index
    %283 = arith.index_cast %c4_i32 : i32 to index
    %284 = memref.load %arg1[%c4_58, %283] : memref<6x8xf32, #tpu.memory_space<smem>>
    %c5_59 = arith.constant 5 : index
    %285 = arith.index_cast %c4_i32 : i32 to index
    %286 = memref.load %arg1[%c5_59, %285] : memref<6x8xf32, #tpu.memory_space<smem>>
    %287 = vector.broadcast %276 : f32 to vector<4x256xf32>
    %288 = arith.cmpf olt, %287, %14 : vector<4x256xf32>
    %289 = arith.andi %6, %288 : vector<4x256xi1>
    %290 = vector.broadcast %276 : f32 to vector<4x256xf32>
    %291 = arith.cmpf oge, %290, %14 : vector<4x256xf32>
    %292 = arith.andi %6, %291 : vector<4x256xi1>
    %293 = arith.subf %249, %274 : vector<4x256xf32>
    %294 = vector.broadcast %282 : f32 to vector<4x256xf32>
    %295 = arith.mulf %294, %293 : vector<4x256xf32>
    %296 = arith.addf %274, %295 : vector<4x256xf32>
    %297 = vector.broadcast %280 : f32 to vector<4x256xf32>
    %298 = arith.mulf %297, %18 : vector<4x256xf32>
    %299 = arith.subf %10, %274 : vector<4x256xf32>
    %300 = arith.mulf %298, %299 : vector<4x256xf32>
    %301 = arith.addf %274, %300 : vector<4x256xf32>
    %cst_60 = arith.constant 0.000000e+00 : f32
    %302 = vector.broadcast %cst_60 : f32 to vector<4x256xf32>
    %303 = arith.mulf %302, %274 : vector<4x256xf32>
    %cst_61 = arith.constant 1.000000e+00 : f32
    %304 = vector.broadcast %cst_61 : f32 to vector<4x256xf32>
    %305 = arith.mulf %304, %10 : vector<4x256xf32>
    %306 = arith.addf %303, %305 : vector<4x256xf32>
    %307 = arith.select %289, %301, %296 : vector<4x256xi1>, vector<4x256xf32>
    %308 = arith.select %292, %306, %307 : vector<4x256xi1>, vector<4x256xf32>
    %309 = vector.broadcast %278 : f32 to vector<4x256xf32>
    %310 = arith.subf %309, %21 : vector<4x256xf32>
    %cst_62 = arith.constant 0.000000e+00 : f32
    %311 = vector.broadcast %cst_62 : f32 to vector<4x256xf32>
    %312 = arith.maximumf %310, %311 : vector<4x256xf32>
    %313 = math.sqrt %312 : vector<4x256xf32>
    %314 = vector.broadcast %284 : f32 to vector<4x256xf32>
    %315 = arith.select %292, %313, %314 : vector<4x256xi1>, vector<4x256xf32>
    %c0_63 = arith.constant 0 : index
    %316 = arith.index_cast %c4_i32 : i32 to index
    %c0_64 = arith.constant 0 : index
    %c0_65 = arith.constant 0 : index
    %317 = vector.load %arg5[%c0_63, %316, %c0_64, %c0_65] : memref<1x8x4x256xf32, #tpu.memory_space<vmem>>, vector<1x1x4x256xf32>
    %318 = vector.shape_cast %317 : vector<1x1x4x256xf32> to vector<4x256xf32>
    %319 = arith.mulf %315, %318 : vector<4x256xf32>
    %320 = arith.addf %308, %319 : vector<4x256xf32>
    %321 = vector.broadcast %286 : f32 to vector<4x4xf32>
    %322 = arith.mulf %4, %321 : vector<4x4xf32>
    %323 = vector.extract_strided_slice %322 {offsets = [0, 0], sizes = [4, 1], strides = [1, 1]} : vector<4x4xf32> to vector<4x1xf32>
    %324 = vector.extract_strided_slice %320 {offsets = [0, 0], sizes = [1, 256], strides = [1, 1]} : vector<4x256xf32> to vector<1x256xf32>
    %325 = vector.broadcast %323 : vector<4x1xf32> to vector<4x256xf32>
    %326 = vector.broadcast %324 : vector<1x256xf32> to vector<4x256xf32>
    %327 = arith.mulf %325, %326 : vector<4x256xf32>
    %328 = vector.extract_strided_slice %322 {offsets = [0, 1], sizes = [4, 1], strides = [1, 1]} : vector<4x4xf32> to vector<4x1xf32>
    %329 = vector.extract_strided_slice %320 {offsets = [1, 0], sizes = [1, 256], strides = [1, 1]} : vector<4x256xf32> to vector<1x256xf32>
    %330 = vector.broadcast %328 : vector<4x1xf32> to vector<4x256xf32>
    %331 = vector.broadcast %329 : vector<1x256xf32> to vector<4x256xf32>
    %332 = arith.mulf %330, %331 : vector<4x256xf32>
    %333 = arith.addf %327, %332 : vector<4x256xf32>
    %334 = vector.extract_strided_slice %322 {offsets = [0, 2], sizes = [4, 1], strides = [1, 1]} : vector<4x4xf32> to vector<4x1xf32>
    %335 = vector.extract_strided_slice %320 {offsets = [2, 0], sizes = [1, 256], strides = [1, 1]} : vector<4x256xf32> to vector<1x256xf32>
    %336 = vector.broadcast %334 : vector<4x1xf32> to vector<4x256xf32>
    %337 = vector.broadcast %335 : vector<1x256xf32> to vector<4x256xf32>
    %338 = arith.mulf %336, %337 : vector<4x256xf32>
    %339 = arith.addf %333, %338 : vector<4x256xf32>
    %340 = vector.extract_strided_slice %322 {offsets = [0, 3], sizes = [4, 1], strides = [1, 1]} : vector<4x4xf32> to vector<4x1xf32>
    %341 = vector.extract_strided_slice %320 {offsets = [3, 0], sizes = [1, 256], strides = [1, 1]} : vector<4x256xf32> to vector<1x256xf32>
    %342 = vector.broadcast %340 : vector<4x1xf32> to vector<4x256xf32>
    %343 = vector.broadcast %341 : vector<1x256xf32> to vector<4x256xf32>
    %344 = arith.mulf %342, %343 : vector<4x256xf32>
    %345 = arith.addf %339, %344 : vector<4x256xf32>
    %c5_i32 = arith.constant 5 : i32
    %c0_66 = arith.constant 0 : index
    %346 = arith.index_cast %c5_i32 : i32 to index
    %347 = memref.load %arg1[%c0_66, %346] : memref<6x8xf32, #tpu.memory_space<smem>>
    %c1_67 = arith.constant 1 : index
    %348 = arith.index_cast %c5_i32 : i32 to index
    %349 = memref.load %arg1[%c1_67, %348] : memref<6x8xf32, #tpu.memory_space<smem>>
    %c2_68 = arith.constant 2 : index
    %350 = arith.index_cast %c5_i32 : i32 to index
    %351 = memref.load %arg1[%c2_68, %350] : memref<6x8xf32, #tpu.memory_space<smem>>
    %c3_69 = arith.constant 3 : index
    %352 = arith.index_cast %c5_i32 : i32 to index
    %353 = memref.load %arg1[%c3_69, %352] : memref<6x8xf32, #tpu.memory_space<smem>>
    %c4_70 = arith.constant 4 : index
    %354 = arith.index_cast %c5_i32 : i32 to index
    %355 = memref.load %arg1[%c4_70, %354] : memref<6x8xf32, #tpu.memory_space<smem>>
    %c5_71 = arith.constant 5 : index
    %356 = arith.index_cast %c5_i32 : i32 to index
    %357 = memref.load %arg1[%c5_71, %356] : memref<6x8xf32, #tpu.memory_space<smem>>
    %358 = vector.broadcast %347 : f32 to vector<4x256xf32>
    %359 = arith.cmpf olt, %358, %14 : vector<4x256xf32>
    %360 = arith.andi %6, %359 : vector<4x256xi1>
    %361 = vector.broadcast %347 : f32 to vector<4x256xf32>
    %362 = arith.cmpf oge, %361, %14 : vector<4x256xf32>
    %363 = arith.andi %6, %362 : vector<4x256xi1>
    %364 = arith.subf %320, %345 : vector<4x256xf32>
    %365 = vector.broadcast %353 : f32 to vector<4x256xf32>
    %366 = arith.mulf %365, %364 : vector<4x256xf32>
    %367 = arith.addf %345, %366 : vector<4x256xf32>
    %368 = vector.broadcast %351 : f32 to vector<4x256xf32>
    %369 = arith.mulf %368, %18 : vector<4x256xf32>
    %370 = arith.subf %10, %345 : vector<4x256xf32>
    %371 = arith.mulf %369, %370 : vector<4x256xf32>
    %372 = arith.addf %345, %371 : vector<4x256xf32>
    %cst_72 = arith.constant 0.000000e+00 : f32
    %373 = vector.broadcast %cst_72 : f32 to vector<4x256xf32>
    %374 = arith.mulf %373, %345 : vector<4x256xf32>
    %cst_73 = arith.constant 1.000000e+00 : f32
    %375 = vector.broadcast %cst_73 : f32 to vector<4x256xf32>
    %376 = arith.mulf %375, %10 : vector<4x256xf32>
    %377 = arith.addf %374, %376 : vector<4x256xf32>
    %378 = arith.select %360, %372, %367 : vector<4x256xi1>, vector<4x256xf32>
    %379 = arith.select %363, %377, %378 : vector<4x256xi1>, vector<4x256xf32>
    %380 = vector.broadcast %349 : f32 to vector<4x256xf32>
    %381 = arith.subf %380, %21 : vector<4x256xf32>
    %cst_74 = arith.constant 0.000000e+00 : f32
    %382 = vector.broadcast %cst_74 : f32 to vector<4x256xf32>
    %383 = arith.maximumf %381, %382 : vector<4x256xf32>
    %384 = math.sqrt %383 : vector<4x256xf32>
    %385 = vector.broadcast %355 : f32 to vector<4x256xf32>
    %386 = arith.select %363, %384, %385 : vector<4x256xi1>, vector<4x256xf32>
    %c0_75 = arith.constant 0 : index
    %387 = arith.index_cast %c5_i32 : i32 to index
    %c0_76 = arith.constant 0 : index
    %c0_77 = arith.constant 0 : index
    %388 = vector.load %arg5[%c0_75, %387, %c0_76, %c0_77] : memref<1x8x4x256xf32, #tpu.memory_space<vmem>>, vector<1x1x4x256xf32>
    %389 = vector.shape_cast %388 : vector<1x1x4x256xf32> to vector<4x256xf32>
    %390 = arith.mulf %386, %389 : vector<4x256xf32>
    %391 = arith.addf %379, %390 : vector<4x256xf32>
    %392 = vector.broadcast %357 : f32 to vector<4x4xf32>
    %393 = arith.mulf %4, %392 : vector<4x4xf32>
    %394 = vector.extract_strided_slice %393 {offsets = [0, 0], sizes = [4, 1], strides = [1, 1]} : vector<4x4xf32> to vector<4x1xf32>
    %395 = vector.extract_strided_slice %391 {offsets = [0, 0], sizes = [1, 256], strides = [1, 1]} : vector<4x256xf32> to vector<1x256xf32>
    %396 = vector.broadcast %394 : vector<4x1xf32> to vector<4x256xf32>
    %397 = vector.broadcast %395 : vector<1x256xf32> to vector<4x256xf32>
    %398 = arith.mulf %396, %397 : vector<4x256xf32>
    %399 = vector.extract_strided_slice %393 {offsets = [0, 1], sizes = [4, 1], strides = [1, 1]} : vector<4x4xf32> to vector<4x1xf32>
    %400 = vector.extract_strided_slice %391 {offsets = [1, 0], sizes = [1, 256], strides = [1, 1]} : vector<4x256xf32> to vector<1x256xf32>
    %401 = vector.broadcast %399 : vector<4x1xf32> to vector<4x256xf32>
    %402 = vector.broadcast %400 : vector<1x256xf32> to vector<4x256xf32>
    %403 = arith.mulf %401, %402 : vector<4x256xf32>
    %404 = arith.addf %398, %403 : vector<4x256xf32>
    %405 = vector.extract_strided_slice %393 {offsets = [0, 2], sizes = [4, 1], strides = [1, 1]} : vector<4x4xf32> to vector<4x1xf32>
    %406 = vector.extract_strided_slice %391 {offsets = [2, 0], sizes = [1, 256], strides = [1, 1]} : vector<4x256xf32> to vector<1x256xf32>
    %407 = vector.broadcast %405 : vector<4x1xf32> to vector<4x256xf32>
    %408 = vector.broadcast %406 : vector<1x256xf32> to vector<4x256xf32>
    %409 = arith.mulf %407, %408 : vector<4x256xf32>
    %410 = arith.addf %404, %409 : vector<4x256xf32>
    %411 = vector.extract_strided_slice %393 {offsets = [0, 3], sizes = [4, 1], strides = [1, 1]} : vector<4x4xf32> to vector<4x1xf32>
    %412 = vector.extract_strided_slice %391 {offsets = [3, 0], sizes = [1, 256], strides = [1, 1]} : vector<4x256xf32> to vector<1x256xf32>
    %413 = vector.broadcast %411 : vector<4x1xf32> to vector<4x256xf32>
    %414 = vector.broadcast %412 : vector<1x256xf32> to vector<4x256xf32>
    %415 = arith.mulf %413, %414 : vector<4x256xf32>
    %416 = arith.addf %410, %415 : vector<4x256xf32>
    %c6_i32 = arith.constant 6 : i32
    %c0_78 = arith.constant 0 : index
    %417 = arith.index_cast %c6_i32 : i32 to index
    %418 = memref.load %arg1[%c0_78, %417] : memref<6x8xf32, #tpu.memory_space<smem>>
    %c1_79 = arith.constant 1 : index
    %419 = arith.index_cast %c6_i32 : i32 to index
    %420 = memref.load %arg1[%c1_79, %419] : memref<6x8xf32, #tpu.memory_space<smem>>
    %c2_80 = arith.constant 2 : index
    %421 = arith.index_cast %c6_i32 : i32 to index
    %422 = memref.load %arg1[%c2_80, %421] : memref<6x8xf32, #tpu.memory_space<smem>>
    %c3_81 = arith.constant 3 : index
    %423 = arith.index_cast %c6_i32 : i32 to index
    %424 = memref.load %arg1[%c3_81, %423] : memref<6x8xf32, #tpu.memory_space<smem>>
    %c4_82 = arith.constant 4 : index
    %425 = arith.index_cast %c6_i32 : i32 to index
    %426 = memref.load %arg1[%c4_82, %425] : memref<6x8xf32, #tpu.memory_space<smem>>
    %c5_83 = arith.constant 5 : index
    %427 = arith.index_cast %c6_i32 : i32 to index
    %428 = memref.load %arg1[%c5_83, %427] : memref<6x8xf32, #tpu.memory_space<smem>>
    %429 = vector.broadcast %418 : f32 to vector<4x256xf32>
    %430 = arith.cmpf olt, %429, %14 : vector<4x256xf32>
    %431 = arith.andi %6, %430 : vector<4x256xi1>
    %432 = vector.broadcast %418 : f32 to vector<4x256xf32>
    %433 = arith.cmpf oge, %432, %14 : vector<4x256xf32>
    %434 = arith.andi %6, %433 : vector<4x256xi1>
    %435 = arith.subf %391, %416 : vector<4x256xf32>
    %436 = vector.broadcast %424 : f32 to vector<4x256xf32>
    %437 = arith.mulf %436, %435 : vector<4x256xf32>
    %438 = arith.addf %416, %437 : vector<4x256xf32>
    %439 = vector.broadcast %422 : f32 to vector<4x256xf32>
    %440 = arith.mulf %439, %18 : vector<4x256xf32>
    %441 = arith.subf %10, %416 : vector<4x256xf32>
    %442 = arith.mulf %440, %441 : vector<4x256xf32>
    %443 = arith.addf %416, %442 : vector<4x256xf32>
    %cst_84 = arith.constant 0.000000e+00 : f32
    %444 = vector.broadcast %cst_84 : f32 to vector<4x256xf32>
    %445 = arith.mulf %444, %416 : vector<4x256xf32>
    %cst_85 = arith.constant 1.000000e+00 : f32
    %446 = vector.broadcast %cst_85 : f32 to vector<4x256xf32>
    %447 = arith.mulf %446, %10 : vector<4x256xf32>
    %448 = arith.addf %445, %447 : vector<4x256xf32>
    %449 = arith.select %431, %443, %438 : vector<4x256xi1>, vector<4x256xf32>
    %450 = arith.select %434, %448, %449 : vector<4x256xi1>, vector<4x256xf32>
    %451 = vector.broadcast %420 : f32 to vector<4x256xf32>
    %452 = arith.subf %451, %21 : vector<4x256xf32>
    %cst_86 = arith.constant 0.000000e+00 : f32
    %453 = vector.broadcast %cst_86 : f32 to vector<4x256xf32>
    %454 = arith.maximumf %452, %453 : vector<4x256xf32>
    %455 = math.sqrt %454 : vector<4x256xf32>
    %456 = vector.broadcast %426 : f32 to vector<4x256xf32>
    %457 = arith.select %434, %455, %456 : vector<4x256xi1>, vector<4x256xf32>
    %c0_87 = arith.constant 0 : index
    %458 = arith.index_cast %c6_i32 : i32 to index
    %c0_88 = arith.constant 0 : index
    %c0_89 = arith.constant 0 : index
    %459 = vector.load %arg5[%c0_87, %458, %c0_88, %c0_89] : memref<1x8x4x256xf32, #tpu.memory_space<vmem>>, vector<1x1x4x256xf32>
    %460 = vector.shape_cast %459 : vector<1x1x4x256xf32> to vector<4x256xf32>
    %461 = arith.mulf %457, %460 : vector<4x256xf32>
    %462 = arith.addf %450, %461 : vector<4x256xf32>
    %463 = vector.broadcast %428 : f32 to vector<4x4xf32>
    %464 = arith.mulf %4, %463 : vector<4x4xf32>
    %465 = vector.extract_strided_slice %464 {offsets = [0, 0], sizes = [4, 1], strides = [1, 1]} : vector<4x4xf32> to vector<4x1xf32>
    %466 = vector.extract_strided_slice %462 {offsets = [0, 0], sizes = [1, 256], strides = [1, 1]} : vector<4x256xf32> to vector<1x256xf32>
    %467 = vector.broadcast %465 : vector<4x1xf32> to vector<4x256xf32>
    %468 = vector.broadcast %466 : vector<1x256xf32> to vector<4x256xf32>
    %469 = arith.mulf %467, %468 : vector<4x256xf32>
    %470 = vector.extract_strided_slice %464 {offsets = [0, 1], sizes = [4, 1], strides = [1, 1]} : vector<4x4xf32> to vector<4x1xf32>
    %471 = vector.extract_strided_slice %462 {offsets = [1, 0], sizes = [1, 256], strides = [1, 1]} : vector<4x256xf32> to vector<1x256xf32>
    %472 = vector.broadcast %470 : vector<4x1xf32> to vector<4x256xf32>
    %473 = vector.broadcast %471 : vector<1x256xf32> to vector<4x256xf32>
    %474 = arith.mulf %472, %473 : vector<4x256xf32>
    %475 = arith.addf %469, %474 : vector<4x256xf32>
    %476 = vector.extract_strided_slice %464 {offsets = [0, 2], sizes = [4, 1], strides = [1, 1]} : vector<4x4xf32> to vector<4x1xf32>
    %477 = vector.extract_strided_slice %462 {offsets = [2, 0], sizes = [1, 256], strides = [1, 1]} : vector<4x256xf32> to vector<1x256xf32>
    %478 = vector.broadcast %476 : vector<4x1xf32> to vector<4x256xf32>
    %479 = vector.broadcast %477 : vector<1x256xf32> to vector<4x256xf32>
    %480 = arith.mulf %478, %479 : vector<4x256xf32>
    %481 = arith.addf %475, %480 : vector<4x256xf32>
    %482 = vector.extract_strided_slice %464 {offsets = [0, 3], sizes = [4, 1], strides = [1, 1]} : vector<4x4xf32> to vector<4x1xf32>
    %483 = vector.extract_strided_slice %462 {offsets = [3, 0], sizes = [1, 256], strides = [1, 1]} : vector<4x256xf32> to vector<1x256xf32>
    %484 = vector.broadcast %482 : vector<4x1xf32> to vector<4x256xf32>
    %485 = vector.broadcast %483 : vector<1x256xf32> to vector<4x256xf32>
    %486 = arith.mulf %484, %485 : vector<4x256xf32>
    %487 = arith.addf %481, %486 : vector<4x256xf32>
    %c7_i32 = arith.constant 7 : i32
    %c0_90 = arith.constant 0 : index
    %488 = arith.index_cast %c7_i32 : i32 to index
    %489 = memref.load %arg1[%c0_90, %488] : memref<6x8xf32, #tpu.memory_space<smem>>
    %c1_91 = arith.constant 1 : index
    %490 = arith.index_cast %c7_i32 : i32 to index
    %491 = memref.load %arg1[%c1_91, %490] : memref<6x8xf32, #tpu.memory_space<smem>>
    %c2_92 = arith.constant 2 : index
    %492 = arith.index_cast %c7_i32 : i32 to index
    %493 = memref.load %arg1[%c2_92, %492] : memref<6x8xf32, #tpu.memory_space<smem>>
    %c3_93 = arith.constant 3 : index
    %494 = arith.index_cast %c7_i32 : i32 to index
    %495 = memref.load %arg1[%c3_93, %494] : memref<6x8xf32, #tpu.memory_space<smem>>
    %c4_94 = arith.constant 4 : index
    %496 = arith.index_cast %c7_i32 : i32 to index
    %497 = memref.load %arg1[%c4_94, %496] : memref<6x8xf32, #tpu.memory_space<smem>>
    %c5_95 = arith.constant 5 : index
    %498 = arith.index_cast %c7_i32 : i32 to index
    %499 = memref.load %arg1[%c5_95, %498] : memref<6x8xf32, #tpu.memory_space<smem>>
    %500 = vector.broadcast %489 : f32 to vector<4x256xf32>
    %501 = arith.cmpf olt, %500, %14 : vector<4x256xf32>
    %502 = arith.andi %6, %501 : vector<4x256xi1>
    %503 = vector.broadcast %489 : f32 to vector<4x256xf32>
    %504 = arith.cmpf oge, %503, %14 : vector<4x256xf32>
    %505 = arith.andi %6, %504 : vector<4x256xi1>
    %506 = arith.subf %462, %487 : vector<4x256xf32>
    %507 = vector.broadcast %495 : f32 to vector<4x256xf32>
    %508 = arith.mulf %507, %506 : vector<4x256xf32>
    %509 = arith.addf %487, %508 : vector<4x256xf32>
    %510 = vector.broadcast %493 : f32 to vector<4x256xf32>
    %511 = arith.mulf %510, %18 : vector<4x256xf32>
    %512 = arith.subf %10, %487 : vector<4x256xf32>
    %513 = arith.mulf %511, %512 : vector<4x256xf32>
    %514 = arith.addf %487, %513 : vector<4x256xf32>
    %cst_96 = arith.constant 0.000000e+00 : f32
    %515 = vector.broadcast %cst_96 : f32 to vector<4x256xf32>
    %516 = arith.mulf %515, %487 : vector<4x256xf32>
    %cst_97 = arith.constant 1.000000e+00 : f32
    %517 = vector.broadcast %cst_97 : f32 to vector<4x256xf32>
    %518 = arith.mulf %517, %10 : vector<4x256xf32>
    %519 = arith.addf %516, %518 : vector<4x256xf32>
    %520 = arith.select %502, %514, %509 : vector<4x256xi1>, vector<4x256xf32>
    %521 = arith.select %505, %519, %520 : vector<4x256xi1>, vector<4x256xf32>
    %522 = vector.broadcast %491 : f32 to vector<4x256xf32>
    %523 = arith.subf %522, %21 : vector<4x256xf32>
    %cst_98 = arith.constant 0.000000e+00 : f32
    %524 = vector.broadcast %cst_98 : f32 to vector<4x256xf32>
    %525 = arith.maximumf %523, %524 : vector<4x256xf32>
    %526 = math.sqrt %525 : vector<4x256xf32>
    %527 = vector.broadcast %497 : f32 to vector<4x256xf32>
    %528 = arith.select %505, %526, %527 : vector<4x256xi1>, vector<4x256xf32>
    %c0_99 = arith.constant 0 : index
    %529 = arith.index_cast %c7_i32 : i32 to index
    %c0_100 = arith.constant 0 : index
    %c0_101 = arith.constant 0 : index
    %530 = vector.load %arg5[%c0_99, %529, %c0_100, %c0_101] : memref<1x8x4x256xf32, #tpu.memory_space<vmem>>, vector<1x1x4x256xf32>
    %531 = vector.shape_cast %530 : vector<1x1x4x256xf32> to vector<4x256xf32>
    %532 = arith.mulf %528, %531 : vector<4x256xf32>
    %533 = arith.addf %521, %532 : vector<4x256xf32>
    %534 = vector.broadcast %499 : f32 to vector<4x4xf32>
    %535 = arith.mulf %4, %534 : vector<4x4xf32>
    %536 = vector.extract_strided_slice %535 {offsets = [0, 0], sizes = [4, 1], strides = [1, 1]} : vector<4x4xf32> to vector<4x1xf32>
    %537 = vector.extract_strided_slice %533 {offsets = [0, 0], sizes = [1, 256], strides = [1, 1]} : vector<4x256xf32> to vector<1x256xf32>
    %538 = vector.broadcast %536 : vector<4x1xf32> to vector<4x256xf32>
    %539 = vector.broadcast %537 : vector<1x256xf32> to vector<4x256xf32>
    %540 = arith.mulf %538, %539 : vector<4x256xf32>
    %541 = vector.extract_strided_slice %535 {offsets = [0, 1], sizes = [4, 1], strides = [1, 1]} : vector<4x4xf32> to vector<4x1xf32>
    %542 = vector.extract_strided_slice %533 {offsets = [1, 0], sizes = [1, 256], strides = [1, 1]} : vector<4x256xf32> to vector<1x256xf32>
    %543 = vector.broadcast %541 : vector<4x1xf32> to vector<4x256xf32>
    %544 = vector.broadcast %542 : vector<1x256xf32> to vector<4x256xf32>
    %545 = arith.mulf %543, %544 : vector<4x256xf32>
    %546 = arith.addf %540, %545 : vector<4x256xf32>
    %547 = vector.extract_strided_slice %535 {offsets = [0, 2], sizes = [4, 1], strides = [1, 1]} : vector<4x4xf32> to vector<4x1xf32>
    %548 = vector.extract_strided_slice %533 {offsets = [2, 0], sizes = [1, 256], strides = [1, 1]} : vector<4x256xf32> to vector<1x256xf32>
    %549 = vector.broadcast %547 : vector<4x1xf32> to vector<4x256xf32>
    %550 = vector.broadcast %548 : vector<1x256xf32> to vector<4x256xf32>
    %551 = arith.mulf %549, %550 : vector<4x256xf32>
    %552 = arith.addf %546, %551 : vector<4x256xf32>
    %553 = vector.extract_strided_slice %535 {offsets = [0, 3], sizes = [4, 1], strides = [1, 1]} : vector<4x4xf32> to vector<4x1xf32>
    %554 = vector.extract_strided_slice %533 {offsets = [3, 0], sizes = [1, 256], strides = [1, 1]} : vector<4x256xf32> to vector<1x256xf32>
    %555 = vector.broadcast %553 : vector<4x1xf32> to vector<4x256xf32>
    %556 = vector.broadcast %554 : vector<1x256xf32> to vector<4x256xf32>
    %557 = arith.mulf %555, %556 : vector<4x256xf32>
    %558 = arith.addf %552, %557 : vector<4x256xf32>
    %c7_i32_102 = arith.constant 7 : i32
    %c0_103 = arith.constant 0 : index
    %c0_104 = arith.constant 0 : index
    %c0_105 = arith.constant 0 : index
    %559 = vector.load %arg6[%c0_103, %c0_104, %c0_105] : memref<1x4x256xf32, #tpu.memory_space<vmem>>, vector<1x4x256xf32>
    %560 = vector.shape_cast %559 : vector<1x4x256xf32> to vector<4x256xf32>
    %561 = vector.shape_cast %558 : vector<4x256xf32> to vector<1x4x256xf32>
    tpu.vector_store %arg6[%c0_103, %c0_104, %c0_105], %561 {strides = array<i32>} : memref<1x4x256xf32, #tpu.memory_space<vmem>>, vector<1x4x256xf32>,
    return
  }
  func.func @transform_0(%arg0: i32) -> (i32, i32) {
    %c0_i32 = arith.constant 0 : i32
    %c0_i32_0 = arith.constant 0 : i32
    %c0_i32_1 = arith.constant 0 : i32
    return %c0_i32, %c0_i32_0 : i32, i32
  }
  func.func @transform_1(%arg0: i32) -> (i32, i32) {
    %c0_i32 = arith.constant 0 : i32
    %c0_i32_0 = arith.constant 0 : i32
    %c0_i32_1 = arith.constant 0 : i32
    return %c0_i32, %c0_i32_0 : i32, i32
  }
  func.func @transform_2(%arg0: i32) -> (i32, i32, i32) {
    %c0_i32 = arith.constant 0 : i32
    %c0_i32_0 = arith.constant 0 : i32
    %c0_i32_1 = arith.constant 0 : i32
    return %arg0, %c0_i32, %c0_i32_0 : i32, i32, i32
  }
  func.func @transform_3(%arg0: i32) -> (i32, i32, i32) {
    %c0_i32 = arith.constant 0 : i32
    %c0_i32_0 = arith.constant 0 : i32
    %c0_i32_1 = arith.constant 0 : i32
    return %arg0, %c0_i32, %c0_i32_0 : i32, i32, i32
  }
  func.func @transform_4(%arg0: i32) -> (i32, i32, i32, i32) {
    %c0_i32 = arith.constant 0 : i32
    %c0_i32_0 = arith.constant 0 : i32
    %c0_i32_1 = arith.constant 0 : i32
    %c0_i32_2 = arith.constant 0 : i32
    return %arg0, %c0_i32, %c0_i32_0, %c0_i32_1 : i32, i32, i32, i32
  }
  func.func @transform_5(%arg0: i32) -> (i32, i32, i32) {
    %c0_i32 = arith.constant 0 : i32
    %c0_i32_0 = arith.constant 0 : i32
    %c0_i32_1 = arith.constant 0 : i32
    return %arg0, %c0_i32, %c0_i32_0 : i32, i32, i32
  }
}

</mosaic_0001>

<bundles_post_ra>
// kernel: tpu_custom_call.1
= control target key start
LH: loop header
LB: loop body
LE: loop exit
PB: predicated region body
PF: predicated region fallthrough
CT: control target
= control target key end

     0   :  { %s3148_s0 = inlined_call_operand.hbm [shape: f32[6,8], index: 0, kind: input, shape index: {}]   ;;  %s3149_s1 = inlined_call_operand.hbm [shape: f32[4,4], index: 1, kind: input, shape index: {}]   ;;  %s3150_s2 = inlined_call_operand.hbm [shape: f32[2,4,256], index: 2, kind: input, shape index: {}]   ;;  %s3151_s3 = inlined_call_operand.hbm [shape: f32[2,4,256], index: 3, kind: input, shape index: {}]   ;;  %s3152_s4 = inlined_call_operand.hbm [shape: f32[2,8,4,256], index: 4, kind: input, shape index: {}]   ;;  %s3153_s5 = inlined_call_operand.hbm [shape: f32[2,4,256], index: 5, kind: output, shape index: {}]  }
   0x1   :  { %3162 = sst [smem:[#allocation19_spill]] %s3150_s2 }
   0x2   :  { %3163 = sst [smem:[#allocation20_spill]] %s3151_s3 }
   0x3   :  { %10 = vsyncpa [#allocation5], 0 }
   0x4   :  { %11 = vsyncpa [#allocation3], 0 }
   0x5   :  { %12 = vsyncpa [#allocation8], 0 }
   0x6   :  { %14 = vsyncpa [#allocation8 + $0x1], 0 }
   0x7   :  { %15 = vsyncpa [#allocation11], 0 }
   0x8   :  { %17 = vsyncpa [#allocation11 + $0x1], 0 }
   0x9   :  { %18 = vsyncpa [#allocation4], 0 }
   0xa   :  { %20 = vsyncpa [#allocation4 + $0x1], 0  ;;  %s2304_s18 = smov 0   ;;  %s2306_s19 = smov 0  }
   0xb   :  { %s2308_s20 = smov 0   ;;  %s2310_s21 = smov 0  }
   0xc LB: > { %s2325_s22 = sadd.s32 1, %s2260_s21   ;;  %s75_s23 = sadd.s32 1, %s2256_s20  ;;  %s2260_s21 = sphi %s2310_s21, %s3207_s21   ;;  %s2256_s20 = sphi %s2308_s20, %s3206_s20   ;;  %s2252_s19 = sphi %s2306_s19, %s3205_s19   ;;  %s2248_s18 = sphi %s2304_s18, %s3204_s18  }
   0xd   : > { %s72_s24 = ssub.s32 %s2260_s21, %s2325_s22  ;;  %p3154_p0 = scmp.ne.s32.totalorder %s2256_s20, %s2252_s19 }
   0xe   : > { %p73_p1 = scmp.eq.s32.totalorder %s72_s24, 0  ;;  %p83_p2 = scmp.eq.s32.totalorder %s2260_s21, 0 }
   0xf   : > { %p1958_p4 = scmp.lt.s32.totalorder %s2260_s21, 2  ;;  %s210_s26 = sand.u32 1, %s2260_s21  }
  0x10   : > { %s2336_s25 = scalar_select %p73_p1, %s2256_s20, %s75_s23  }
  0x11   : > { %p84_p5 = por %p83_p2, %p3154_p0  ;;  %s2343_s27 = sand.u32 1, %s2256_s20  }
  0x12   : > { %3164 = sst [smem:[#allocation18_spill]] %s2336_s25  ;;  %s1844_s28 = sshll.u32 %s2343_s27, 3 }
  0x13   : > { %s1915_s29 = sshll.u32 %s2260_s21, 7  ;;  %s3165_s2 = sld [smem:[#allocation19_spill]] }
  0x14   : > { %s214_s8 = scalar_lea.vmem [#allocation7], %s1844_s28  ;;  %p2354_p6 = pnand %p1958_p4, %p84_p5 }
  0x15   : > { %s222_s9 = sshll.u32 %s214_s8, 4  ;;  %s3167_s3 = sld [smem:[#allocation20_spill]]  ;;  %s2358_s9 = int_to_ptr.vmem [resolvable:$true] %s222_s9 }
  0x16   : > { %s3166_s10 = scalar_select %p2354_p6, 1, 0 }
  0x17   : > { %s2365_s14 = scalar_lea.sflag [#allocation8], %s210_s26  ;;  %p2371_p8 = pneg %p2354_p6 }
  0x19   : > { %s2350_s7 = scalar_lea.hbm %s3165_s2, %s1915_s29  ;;  %s2056_s24 = scalar_lea.hbm %s3165_s2, 256 }
  0x1a   : > { %s2051_s15 = scalar_lea.hbm %s2350_s7, 128  ;;  %p2057_p11 = scmp.lt.u32.totalorder %s2350_s7, %s3165_s2 }
  0x1b   : > { %s2363_s13 = scalar_lea.hbm %s3167_s3, %s1915_s29  ;;  %p2052_p7 = scmp.ne.s32.totalorder %s2350_s7, %s2051_s15 }
  0x1c   : > { %p2058_p12 = scmp.lt.u32.totalorder %s2056_s24, %s2051_s15  ;;  %p2060_p1 = scmp.lt.u32.totalorder %s2051_s15, %s2350_s7 }
  0x1d   : > { %p2054_p9 = pnand %p2371_p8, %p2052_p7 }
  0x1e   : > { %p2059_p13 = por %p2058_p12, %p2057_p11 }
  0x1f   : > { %p2055_p10 = pneg %p2054_p9 }
  0x20   : > { %p2061_p2 = por %p2060_p1, %p2059_p13 }
  0x22   : > { %p2062_p4 = pnand %p2061_p2, %p2055_p10 }
  0x24   : > { %2065 = shalt.err (!%p2062_p4)
}
  0x25   : > { %s2066_s26 = scalar_lea.vmem %s2358_s9, 128  ;;  %s2262_s6 = smov [#allocation7]  }
  0x26   : > { %p2067_p5 = scmp.ne.s32.totalorder %s2358_s9, %s2066_s26  ;;  %s2071_s8 = sshll.u32 %s2262_s6, 4  ;;  %s2072_s8 = int_to_ptr.vmem [resolvable:$false] %s2071_s8 }
  0x27   : > { %s2073_s11 = scalar_lea.vmem %s2072_s8, 256  ;;  %p2074_p3 = scmp.lt.s32.totalorder %s2358_s9, %s2072_s8 }
  0x28   : > { %p2069_p7 = pnand %p2067_p5, %p2371_p8  ;;  %p2075_p0 = scmp.lt.s32.totalorder %s2073_s11, %s2066_s26 }
  0x2a   : > { %p2070_p9 = pneg %p2069_p7  ;;  %p2076_p11 = por %p2075_p0, %p2074_p3 }
  0x2c   : > { %p2077_p12 = pnand %p2076_p11, %p2070_p9 }
  0x2e   : > { %2080 = shalt.err (!%p2077_p12)
}
  0x2f   : > { %1945 = dma.hbm_to_vmem [thread:$0]  (!%p2354_p6), %s2350_s7, 128, %s2358_s9, %s2365_s14  }
  0x30   : > { %s2396_s12 = sadd.s32 4294967295, %s2260_s21   ;;  %s1839_s15 = sadd.s32 4294967294, %s2260_s21  }
  0x31   : > { %p88_p0 = scmp.ne.s32.totalorder %s2252_s19, %s2248_s18  ;;  %p3155_p3 = scmp.eq.s32.totalorder %s2396_s12, 0 }
  0x32   : > { %p164_p10 = scmp.eq.s32.totalorder %s2396_s12, 1  ;;  %p170_p13 = scmp.eq.s32.totalorder %s1839_s15, 1 }
  0x33   : > { %p2405_p1 = por %p3155_p3, %p88_p0  ;;  %p1840_p2 = scmp.ge.s32.totalorder %s2260_s21, 1 }
  0x34   : > { %p3170_p4 = scmp.ne.s32.totalorder %s2256_s20, %s2252_s19  ;;  %p2417_p7 = por %p170_p13, %p88_p0 }
  0x35   : > { %s3169_s17 = scalar_select %p2405_p1, 1, 0 }
  0x36   : > { %p2413_p5 = por %p164_p10, %p3170_p4  ;;  %p177_p9 = scmp.lt.s32.totalorder %s2260_s21, 3 }
  0x37   : > { %s3172_s9 = scalar_select %p2417_p7, 1, 0 }
  0x38   : > { %s3171_s7 = scalar_select %p2413_p5, 1, 0 }
  0x39   : > { %p2422_p11 = pnand %p1840_p2, %p177_p9  ;;  %s2263_s24 = smov [#allocation6]  }
  0x3a   : > { %s199_s30 = sshll.u32 %s2263_s24, 4  ;;  %s233_s29 = scalar_lea.vmem [#allocation9], %s1844_s28  ;;  %s2426_s30 = int_to_ptr.vmem [resolvable:$true] %s199_s30 }
  0x3b   : > { %s3173_s23 = scalar_select %p2422_p11, 1, 0 }
  0x3c   : > { %s241_s26 = sshll.u32 %s233_s29, 4  ;;  %s2081_s6 = scalar_lea.hbm %s2363_s13, 128  ;;  %s242_s26 = int_to_ptr.vmem [resolvable:$true] %s241_s26 }
  0x3d   : > { %p2082_p0 = scmp.ne.s32.totalorder %s2363_s13, %s2081_s6  ;;  %s2086_s15 = scalar_lea.hbm %s3167_s3, 256 }
  0x3e   : > { %p2087_p2 = scmp.lt.u32.totalorder %s2363_s13, %s3167_s3  ;;  %p2088_p4 = scmp.lt.u32.totalorder %s2086_s15, %s2081_s6 }
  0x3f   : > { %p2084_p10 = pnand %p2082_p0, %p2371_p8  ;;  %p2090_p3 = scmp.lt.u32.totalorder %s2081_s6, %s2363_s13 }
  0x40   : > { %p2089_p9 = por %p2088_p4, %p2087_p2 }
  0x41   : > { %p2085_p13 = pneg %p2084_p10 }
  0x42   : > { %p2091_p7 = por %p2090_p3, %p2089_p9 }
  0x44   : > { %p2092_p5 = pnand %p2091_p7, %p2085_p13 }
  0x46   : > { %2095 = shalt.err (!%p2092_p5)
}
  0x47   : > { %s2096_s28 = scalar_lea.vmem %s242_s26, 128  ;;  %s2264_s24 = smov [#allocation9]  }
  0x48   : > { %p2097_p12 = scmp.ne.s32.totalorder %s242_s26, %s2096_s28  ;;  %s2101_s29 = sshll.u32 %s2264_s24, 4  ;;  %s2102_s29 = int_to_ptr.vmem [resolvable:$false] %s2101_s29 }
  0x49   : > { %s2103_s8 = scalar_lea.vmem %s2102_s29, 256  ;;  %p2104_p1 = scmp.lt.s32.totalorder %s242_s26, %s2102_s29 }
  0x4a   : > { %p2099_p0 = pnand %p2097_p12, %p2371_p8  ;;  %p2105_p11 = scmp.lt.s32.totalorder %s2103_s8, %s2096_s28 }
  0x4c   : > { %p2100_p10 = pneg %p2099_p0  ;;  %p2106_p6 = por %p2105_p11, %p2104_p1 }
  0x4e   : > { %p2107_p2 = pnand %p2106_p6, %p2100_p10 }
  0x50   : > { %2110 = shalt.err (!%p2107_p2)
}
  0x51   : > { %p3174_p4 = scmp.ne.s32.totalorder %s3166_s10, 0  ;;  %p3175_p3 = scmp.eq.s32.totalorder %s2396_s12, 0 }
  0x52   : > { %p3176_p5 = scmp.ne.s32.totalorder %s3173_s23, 0  ;;  %s1917_s6 = sshll.u32 %s2260_s21, 10 }
  0x53   : > { %1948 = dma.hbm_to_vmem [thread:$0]  (!%p3174_p4), %s2363_s13, 128, %s242_s26, %s2365_s14  }
  0x54   : > { %p3177_p7 = pneg %p3176_p5  ;;  %s2111_s28 = scalar_lea.hbm %s3148_s0, 128 }
  0x55   : > { %p2112_p6 = scmp.ne.s32.totalorder %s3148_s0, %s2111_s28  ;;  %p2118_p9 = scmp.lt.u32.totalorder %s2111_s28, %s3148_s0 }
  0x56   : > { %p2455_p12 = pnand %p3177_p7, %p3175_p3 }
  0x58   : > { %p2113_p1 = pneg %p2455_p12 }
  0x5a   : > { %p2114_p11 = pnand %p2113_p1, %p2112_p6 }
  0x5c   : > { %p2115_p13 = pneg %p2114_p11 }
  0x5e   : > { %p2120_p0 = pnand %p2118_p9, %p2115_p13 }
  0x60   : > { %2123 = shalt.err (!%p2120_p0)
}
  0x61   : > { %s2265_s26 = smov [#allocation2]   ;;  %s2124_s29 = scalar_lea.hbm %s3149_s1, 64 }
  0x62   : > { %1938 = dma.hbm_to_smem (!%p2455_p12), %s3148_s0, 128, %s2265_s26, [#allocation5]  }
  0x63   : > { %p2125_p10 = scmp.ne.s32.totalorder %s3149_s1, %s2124_s29  ;;  %p2131_p7 = scmp.lt.u32.totalorder %s2124_s29, %s3149_s1 }
  0x65   : > { %p2127_p2 = pnand %p2125_p10, %p2113_p1 }
  0x67   : > { %p2128_p3 = pneg %p2127_p2 }
  0x69   : > { %p2133_p6 = pnand %p2131_p7, %p2128_p3 }
  0x6b   : > { %2136 = shalt.err (!%p2133_p6)
}
  0x6c   : > { %s2137_s14 = scalar_lea.vmem %s2426_s30, 64  ;;  %p2145_p0 = scmp.lt.s32.totalorder %s2426_s30, %s2426_s30 }
  0x6d   : > { %p2138_p11 = scmp.ne.s32.totalorder %s2426_s30, %s2137_s14  ;;  %p2146_p10 = scmp.lt.s32.totalorder %s2137_s14, %s2137_s14 }
  0x6f   : > { %p2140_p13 = pnand %p2138_p11, %p2113_p1  ;;  %p2147_p2 = por %p2146_p10, %p2145_p0 }
  0x71   : > { %p2141_p9 = pneg %p2140_p13 }
  0x73   : > { %p2148_p5 = pnand %p2147_p2, %p2141_p9 }
  0x75   : > { %2151 = shalt.err (!%p2148_p5)
}
  0x76   : > { %1941 = dma.hbm_to_vmem [thread:$0]  (!%p2455_p12), %s3149_s1, 64, %s2426_s30, [#allocation3]  }
  0x77   : > { %s2508_s11 = scalar_lea.hbm %s3152_s4, %s1917_s6  ;;  %s3179_s15 = sshll.u32 %s2343_s27, 6 }
  0x78   : > { %s252_s24 = scalar_lea.vmem [#allocation10], %s3179_s15  ;;  %s249_s29 = scalar_lea.sflag [#allocation11], %s2343_s27 }
  0x79   : > { %s259_s2 = sshll.u32 %s252_s24, 4  ;;  %s2152_s28 = scalar_lea.hbm %s2508_s11, 1024  ;;  %s2512_s2 = int_to_ptr.vmem [resolvable:$true] %s259_s2 }
  0x7a   : > { %p2153_p5 = scmp.ne.s32.totalorder %s2508_s11, %s2152_s28  ;;  %s2157_s6 = scalar_lea.hbm %s3152_s4, 2048 }
  0x7b   : > { %p2158_p3 = scmp.lt.u32.totalorder %s2508_s11, %s3152_s4  ;;  %p2159_p7 = scmp.lt.u32.totalorder %s2157_s6, %s2152_s28 }
  0x7c   : > { %p2155_p1 = pnand %p2153_p5, %p2371_p8  ;;  %p2161_p11 = scmp.lt.u32.totalorder %s2152_s28, %s2508_s11 }
  0x7d   : > { %p2160_p6 = por %p2159_p7, %p2158_p3 }
  0x7e   : > { %p2156_p12 = pneg %p2155_p1 }
  0x7f   : > { %p2162_p13 = por %p2161_p11, %p2160_p6 }
  0x81   : > { %p2163_p9 = pnand %p2162_p13, %p2156_p12 }
  0x83   : > { %2166 = shalt.err (!%p2163_p9)
}
  0x84   : > { %s2167_s25 = scalar_lea.vmem %s2512_s2, 1024  ;;  %s2266_s26 = smov [#allocation10]  }
  0x85   : > { %p2168_p0 = scmp.ne.s32.totalorder %s2512_s2, %s2167_s25  ;;  %s2172_s8 = sshll.u32 %s2266_s26, 4  ;;  %s2173_s8 = int_to_ptr.vmem [resolvable:$false] %s2172_s8 }
  0x86   : > { %s2174_s15 = scalar_lea.vmem %s2173_s8, 2048  ;;  %p2175_p5 = scmp.lt.s32.totalorder %s2512_s2, %s2173_s8 }
  0x87   : > { %p2170_p10 = pnand %p2168_p0, %p2371_p8  ;;  %p2176_p1 = scmp.lt.s32.totalorder %s2174_s15, %s2167_s25 }
  0x89   : > { %p2171_p2 = pneg %p2170_p10  ;;  %p2177_p3 = por %p2176_p1, %p2175_p5 }
  0x8b   : > { %p2178_p7 = pnand %p2177_p3, %p2171_p2 }
  0x8d   : > { %2181 = shalt.err (!%p2178_p7)
}
  0x8e   : > { %s2267_s24 = smov 128   ;;  %s2268_s28 = smov 8  }
  0x8f   : > { %1951 = dma.hbm_to_vmem [thread:$0]  (!%p3174_p4), %s2508_s11, 1024, %s2512_s2, %s249_s29, %s2267_s24, %s2267_s24, %s2268_s28  }
  0x90   : > { %p3180_p8 = scmp.ne.s32.totalorder %s3173_s23, 0 }
  0x91   : > { %p3181_p12 = scmp.eq.s32.totalorder (!%p3180_p8), %s2396_s12, 0 }
  0x92   : > { %271 = sbr.rel (%p3180_p8) target bundleno = 532 (0x214), region = 40 }
  0x99   : > { %2227 = dma.done.wait (%p3181_p12), [#allocation5], 128   ;;  %p3182_p6 = pmov %p3181_p12 }
  0x9b   : > { %2229 = vsyncadd (%p3182_p6), [#allocation5], 4294967168  ;;  %p3183_p11 = pmov %p3182_p6 }
  0x9c   : > { %p3184_p13 = pmov %p3182_p6 }
  0x9d   : > { %2231 = dma.done.wait (%p3183_p11), [#allocation3], 64  }
  0x9e   : > { %2233 = vsyncadd (%p3184_p13), [#allocation3], 4294967232  ;;  %s281_s27 = sand.u32 1, %s2396_s12   ;;  %s2550_s10 = sand.u32 1, %s2252_s19  }
  0x9f   : > { %s2553_s16 = sshll.u32 %s2550_s10, 3  ;;  %s282_s23 = scalar_lea.sflag [#allocation8], %s281_s27 }
  0xa0   : > { %s285_s11 = scalar_lea.vmem [#allocation7], %s2553_s16  ;;  %p3185_p4 = scmp.ne.s32.totalorder %s3169_s17, 0 }
  0xa2   : > { %2235 = dma.done.wait (%p3185_p4), %s282_s23, 256  }
  0xa3   : > { %2237 = vsyncadd (%p3185_p4), %s282_s23, 4294967040  ;;  %s1858_s2 = sshll.u32 %s2550_s10, 6  ;;  %s294_s29 = scalar_lea.vmem [#allocation9], %s2553_s16 }
  0xa4   : > { %s300_s30 = scalar_lea.sflag [#allocation11], %s2550_s10  ;;  %s2563_s13 = scalar_lea.vmem [#allocation10], %s1858_s2 }
  0xa5   : > { %2239 = dma.done.wait (%p3185_p4), %s300_s30, 1024  }
  0xa6   : > { %2241 = vsyncadd (%p3185_p4), %s300_s30, 4294966272 }
  0xa7   : > { %308 = sfence }
  0xa8   : > { %s1860_s6 = sld [smem:[#allocation2 + $0x280]]  ;;  %v2269_v0 = vmov 0   ;;  %v2270_v1 = vmov 2   ;;  %s1866_s14 = sld [smem:[#allocation2 + $0x281]]  ;;  %v2571_v2 = vld [vmem:[#allocation6] sm:$0xf]  ;;  %v377_v35 = vlaneseq }
  0xa9   : > { %2002 = vset.pattern.permute.xlu0 %v2269_v0  ;;  %2004 = vset.pattern.permute.xlu1 %v2270_v1  ;;  %v2271_v6 = vmov 1   ;;  %v2272_v7 = vmov 3   ;;  %s1873_s17 = sld [smem:[#allocation2 + $0x282]]  ;;  %s1880_s3 = sld [smem:[#allocation2 + $0x283]]  ;;  %v2600_v19 = vld [vmem:[%s294_s29] sm:$0xff]  ;;  %v2629_v33 = vld [vmem:[%s285_s11] sm:$0xff] }
  0xaa   : > { %s1887_s25 = sld [smem:[#allocation2 + $0x284]]  ;;  %s1894_s26 = sld [smem:[#allocation2 + $0x285]]  ;;  %vm344_vm0 = vcmp.gt.f32.partialorder %v2600_v19, 0.1  ;;  %v365_v37 = vld [vmem:[%s2563_s13] sm:$0xff]  ;;  %v378_v40 = vshrl.u32 %v377_v35, 7 }
  0xab   : > { %s1901_s8 = sld [smem:[#allocation2 + $0x286]]  ;;  %v345_v20 = vsel %vm344_vm0, %v2600_v19, 1.0  ;;  %s1908_s15 = sld [smem:[#allocation2 + $0x287]] }
  0xac   : > { %2033 = vrcp.f32 %v345_v20  ;;  %s1862_s24 = sld [smem:[#allocation2 + $0x81]]  ;;  %v2641_v44 = vsub.s32 0, %v378_v40  ;;  %v2645_v46 = vsub.s32 4, %v378_v40  ;;  %v2649_v48 = vsub.s32 1, %v378_v40  ;;  %s2690_s23 = sld [smem:[#allocation2 + $0x82]] }
  0xad   : > { %v2651_v49 = vsub.s32 5, %v378_v40  ;;  %v2653_v50 = vsub.s32 2, %v378_v40  ;;  %v2655_v51 = vsub.s32 6, %v378_v40  ;;  %v2657_v52 = vsub.s32 3, %v378_v40  ;;  %s2684_s28 = sld [smem:[#allocation2 + $0x101]]  ;;  %s2751_s29 = sld [smem:[#allocation2 + $0x102]] }
  0xae   : > { %v369_v3 = vstv %s1860_s6  ;;  %v544_v5 = vstv %s1866_s14  ;;  %v2659_v53 = vsub.s32 7, %v378_v40  ;;  %s2686_s27 = sld [smem:[#allocation2 + $0x1]]  ;;  %s2759_s30 = sld [smem:[#allocation2 + $0x2]] }
  0xaf   : > { %v370_v4 = vmul.f32 %v369_v3, %v2571_v2  ;;  %v545_v8 = vmul.f32 %v544_v5, %v2571_v2  ;;  %v716_v9 = vstv %s1873_s17  ;;  %v888_v11 = vstv %s1880_s3  ;;  %s2692_s11 = sld [smem:[#allocation2 + $0x181]]  ;;  %s2765_s6 = sld [smem:[#allocation2 + $0x83]] }
  0xb0   : > { %v717_v10 = vmul.f32 %v716_v9, %v2571_v2  ;;  %v889_v12 = vmul.f32 %v888_v11, %v2571_v2  ;;  %v1060_v13 = vstv %s1887_s25  ;;  %v1232_v15 = vstv %s1894_s26  ;;  %s2695_s2 = sld [smem:[#allocation2 + $0x201]]  ;;  %s2767_s14 = sld [smem:[#allocation2 + $0x182]] }
  0xb1   : > { %373 = vperm.xlu0 %2002, %v370_v4   ;;  %424 = vperm.xlu1 %2004, %v370_v4   ;;  %v1061_v14 = vmul.f32 %v1060_v13, %v2571_v2  ;;  %v1233_v16 = vmul.f32 %v1232_v15, %v2571_v2  ;;  %v1404_v17 = vstv %s1901_s8  ;;  %v1576_v21 = vstv %s1908_s15  ;;  %s2769_s17 = sld [smem:[#allocation2 + $0x202]]  ;;  %s2810_s3 = sld [smem:[#allocation2 + $0x103]] }
  0xb2   : > { %v1405_v18 = vmul.f32 %v1404_v17, %v2571_v2  ;;  %v1577_v22 = vmul.f32 %v1576_v21, %v2571_v2  ;;  %v528_v36 = vstv %s1862_s24  ;;  %v351_v17 = vmul.f32 10.0, %v2600_v19  ;;  %s2818_s25 = sld [smem:[#allocation2 + $0x3]]  ;;  %s1883_s8 = sld [smem:[#allocation2 + $0x84]] }
  0xb3   : > { %s2824_s26 = sld [smem:[#allocation2 + $0x183]]  ;;  %s2870_s24 = sld [smem:[#allocation2 + $0x104]] }
  0xb4   : > { %s2826_s15 = sld [smem:[#allocation2 + $0x203]]  ;;  %p3200_p0 = scmp.ne.s32.totalorder %s3171_s7, 0 }
  0xb5   : > { %2003 = vset.pattern.permute.xlu0 %v2271_v6  ;;  %2005 = vset.pattern.permute.xlu1 %v2272_v7  ;;  %v491_v40 = vstv %s2692_s11  ;;  %s2884_s11 = sld [smem:[#allocation2 + $0x204]] }
  0xb6   : > { %398 = vperm.xlu0 %2003, %v370_v4   ;;  %450 = vperm.xlu1 %2005, %v370_v4   ;;  %v2034_v23 = vpop.eup %2033 }
  0xb7   : > { %v349_v24 = vmul.f32 0.1, %v2034_v23  ;;  %v2633_v38 = vmul.f32 %v2034_v23, %v2629_v33 }
  0xb9   : > { %v2616_v25 = vsel %vm344_vm0, %v349_v24, 0.0  ;;  %v354_v43 = vsel %vm344_vm0, %v2633_v38, 0.0 }
  0xba   : > { %573 = vperm.xlu0 %2003, %v545_v8   ;;  %2006 = vset.pattern.permute.xlu1 %v2269_v0  ;;  %v2620_v26 = vmul.f32 %v2616_v25, %v2616_v25 }
  0xbb   : > { %548 = vperm.xlu1 %2006, %v545_v8  }
  0xbc   : > { %v355_v27 = vsub.f32 1.0, %v2620_v26  ;;  %v529_v41 = vsub.f32 %v528_v36, %v2620_v26 }
  0xbe   : > { %2008 = vset.pattern.permute.xlu0 %v2272_v7  ;;  %v356_v28 = vmax.f32 %v355_v27, 0.0  ;;  %v2643_v45 = vmax.f32 %v529_v41, 0.0  ;;  %v498_v27 = vstv %s2684_s28  ;;  %s2874_s28 = sld [smem:[#allocation2 + $0x4]] }
  0xbf   : > { %2007 = vset.pattern.permute.xlu1 %v2270_v1  ;;  %625 = vperm.xlu0 %2008, %v545_v8  }
  0xc0   : > { %599 = vperm.xlu1 %2007, %v545_v8   ;;  %2035 = vrsqrt.f32 %v356_v28  ;;  %vm359_vm1 = vcmp.eq.f32.partialorder %v356_v28, inf  ;;  %v362_v31 = vand.u32 2147483648, %v356_v28  ;;  %vm361_vm2 = vcmp.eq.f32.partialorder %v356_v28, 0.0 }
  0xc1   : > { %2037 = vrsqrt.f32 %v2643_v45  ;;  %vm533_vm3 = vcmp.eq.f32.partialorder %v2643_v45, inf  ;;  %vm535_vm5 = vcmp.eq.f32.partialorder %v2643_v45, 0.0 }
  0xc3   : > { %2011 = vset.pattern.permute.xlu0 %v2270_v1 }
  0xc4   : > { %2009 = vset.pattern.permute.xlu1 %v2269_v0  ;;  %771 = vperm.xlu0 %2011, %v717_v10  }
  0xc5   : > { %720 = vperm.xlu1 %2009, %v717_v10  }
  0xc8   : > { %2014 = vset.pattern.permute.xlu0 %v2271_v6 }
  0xc9   : > { %2010 = vset.pattern.permute.xlu1 %v2271_v6  ;;  %917 = vperm.xlu0 %2014, %v889_v12  }
  0xca   : > { %745 = vperm.xlu1 %2010, %v717_v10   ;;  %v2036_v29 = vpop.eup %2035 }
  0xcb   : > { %v358_v30 = vmul.f32 %v2036_v29, %v356_v28 }
  0xcd   : > { %2017 = vset.pattern.permute.xlu0 %v2269_v0  ;;  %v360_v32 = vsel %vm359_vm1, %v356_v28, %v358_v30  ;;  %v2700_v28 = vsel %vm344_vm0, %v351_v17, 0.0  ;;  %v481_v30 = vstv %s2686_s27  ;;  %s2880_s27 = sld [smem:[#allocation2 + $0x85]] }
  0xce   : > { %2012 = vset.pattern.permute.xlu1 %v2272_v7  ;;  %1064 = vperm.xlu0 %2017, %v1061_v14   ;;  %v363_v34 = vsel %vm361_vm2, %v362_v31, %v360_v32  ;;  %v499_v36 = vmul.f32 %v498_v27, %v2700_v28  ;;  %vm484_vm4 = vcmp.ge.f32.partialorder %v481_v30, %v2616_v25 }
  0xcf   : > { %797 = vperm.xlu1 %2012, %v717_v10   ;;  %v364_v39 = vsel %vm344_vm0, %v363_v34, 1.0  ;;  %v2709_v34 = vsel %vm344_vm0, %v2633_v38, %v2629_v33  ;;  %vm2728_vm6 = vmand %vm344_vm0, %vm484_vm4  ;;  %vm482_vm7 = vcmp.lt.f32.partialorder %v481_v30, %v2616_v25 }
  0xd0   : > { %v366_v42 = vmul.f32 %v365_v37, %v364_v39  ;;  %v536_v37 = vand.u32 2147483648, %v2643_v45  ;;  %v700_v39 = vstv %s2690_s23  ;;  %vm483_vm8 = vmand %vm344_vm0, %vm482_vm7  ;;  %s2882_s23 = sld [smem:[#allocation2 + $0x184]] }
  0xd2   : > { %2020 = vset.pattern.permute.xlu0 %v2272_v7  ;;  %v2647_v47 = vadd.f32 %v366_v42, %v354_v43 }
  0xd3   : > { %2013 = vset.pattern.permute.xlu1 %v2269_v0  ;;  %1141 = vperm.xlu0 %2020, %v1061_v14  }
  0xd4   : > { %892 = vperm.xlu1 %2013, %v889_v12   ;;  %v380_v54 = vrot.slane %v2647_v47, %v2641_v44  ;;  %v384_v55 = vrot.slane %v2647_v47, %v2645_v46  ;;  %v404_v56 = vrot.slane %v2647_v47, %v2649_v48  ;;  %v408_v57 = vrot.slane %v2647_v47, %v2651_v49 }
  0xd5   : > { %v430_v58 = vrot.slane %v2647_v47, %v2653_v50  ;;  %v434_v59 = vrot.slane %v2647_v47, %v2655_v51  ;;  %v456_v62 = vrot.slane %v2647_v47, %v2657_v52  ;;  %v460_v63 = vrot.slane %v2647_v47, %v2659_v53 }
  0xd6   : > { %v414_v2 = vrot.slane %v404_v56, %v2649_v48  ;;  %v418_v3 = vrot.slane %v408_v57, %v2649_v48  ;;  %v538_v56 = vstv %s2695_s2  ;;  %s2925_s2 = sld [smem:[#allocation2 + $0x105]] }
  0xd7   : > { %2023 = vset.pattern.permute.xlu0 %v2270_v1  ;;  %v440_v4 = vrot.slane %v430_v58, %v2653_v50  ;;  %v444_v5 = vrot.slane %v434_v59, %v2653_v50 }
  0xd8   : > { %2015 = vset.pattern.permute.xlu1 %v2270_v1  ;;  %1287 = vperm.xlu0 %2023, %v1233_v16  }
  0xd9   : > { %943 = vperm.xlu1 %2015, %v889_v12  }
  0xdc   : > { %2026 = vset.pattern.permute.xlu0 %v2271_v6 }
  0xdd   : > { %2016 = vset.pattern.permute.xlu1 %v2272_v7  ;;  %1433 = vperm.xlu0 %2026, %v1405_v18  }
  0xde   : > { %969 = vperm.xlu1 %2016, %v889_v12  }
  0xe1   : > { %2029 = vset.pattern.permute.xlu0 %v2269_v0 }
  0xe2   : > { %2018 = vset.pattern.permute.xlu1 %v2271_v6  ;;  %1580 = vperm.xlu0 %2029, %v1577_v22  }
  0xe3   : > { %1089 = vperm.xlu1 %2018, %v1061_v14  }
  0xe6   : > { %2032 = vset.pattern.permute.xlu0 %v2272_v7 }
  0xe7   : > { %2019 = vset.pattern.permute.xlu1 %v2270_v1  ;;  %1657 = vperm.xlu0 %2032, %v1577_v22  }
  0xe8   : > { %1115 = vperm.xlu1 %2019, %v1061_v14   ;;  %v2038_v14 = vpop.eup %2037 }
  0xe9   : > { %v532_v29 = vmul.f32 %v2038_v14, %v2643_v45 }
  0xeb   : > { %v534_v41 = vsel %vm533_vm3, %v2643_v45, %v532_v29 }
  0xec   : > { %2021 = vset.pattern.permute.xlu1 %v2269_v0 }
  0xed   : > { %1236 = vperm.xlu1 %2021, %v1233_v16  }
  0xf1   : > { %2022 = vset.pattern.permute.xlu1 %v2271_v6 }
  0xf2   : > { %1261 = vperm.xlu1 %2022, %v1233_v16  }
  0xf6   : > { %2024 = vset.pattern.permute.xlu1 %v2272_v7 }
  0xf7   : > { %1313 = vperm.xlu1 %2024, %v1233_v16  }
  0xfb   : > { %2025 = vset.pattern.permute.xlu1 %v2269_v0  ;;  %v390_v0 = vrot.slane %v380_v54, %v2641_v44  ;;  %v2722_v54 = vcombine.high %v2709_v34, %v2709_v34 }
  0xfc   : > { %1408 = vperm.xlu1 %2025, %v1405_v18  }
 0x100   : > { %2027 = vset.pattern.permute.xlu1 %v2270_v1 }
 0x101   : > { %1459 = vperm.xlu1 %2027, %v1405_v18  }
 0x105   : > { %2028 = vset.pattern.permute.xlu1 %v2272_v7  ;;  %v470_v7 = vrot.slane %v460_v63, %v2657_v52 }
 0x106   : > { %1485 = vperm.xlu1 %2028, %v1405_v18  }
 0x10a   : > { %2030 = vset.pattern.permute.xlu1 %v2271_v6  ;;  %v466_v6 = vrot.slane %v456_v62, %v2657_v52 }
 0x10b   : > { %1605 = vperm.xlu1 %2030, %v1577_v22  }
 0x10f   : > { %2031 = vset.pattern.permute.xlu1 %v2270_v1  ;;  %v394_v1 = vrot.slane %v384_v55, %v2641_v44  ;;  %v701_v55 = vsub.f32 %v700_v39, %v2620_v26 }
 0x110   : > { %1631 = vperm.xlu1 %2031, %v1577_v22  }
 0x130   : > { %v374_v60 = vpop.permute.xlu0 %373  ;;  %v425_v61 = vpop.permute.xlu1 %424 }
 0x131   : > { %v395_v10 = vmul.f32 %v390_v0, %v374_v60  ;;  %v396_v11 = vmul.f32 %v394_v1, %v374_v60  ;;  %v445_v15 = vmul.f32 %v440_v4, %v425_v61  ;;  %v446_v16 = vmul.f32 %v444_v5, %v425_v61  ;;  %v1867_v61 = vld [vmem:[%s2563_s13 + $0x8] sm:$0xff] }
 0x132   : > { %v2738_v1 = vmax.f32 %v701_v55, 0.0 }
 0x134   : > { %2039 = vrsqrt.f32 %v2738_v1  ;;  %vm705_vm9 = vcmp.eq.f32.partialorder %v2738_v1, inf  ;;  %vm707_vm11 = vcmp.eq.f32.partialorder %v2738_v1, 0.0 }
 0x135   : > { %v399_v8 = vpop.permute.xlu0 %398  ;;  %v451_v9 = vpop.permute.xlu1 %450 }
 0x136   : > { %v419_v12 = vmul.f32 %v414_v2, %v399_v8  ;;  %v420_v13 = vmul.f32 %v418_v3, %v399_v8  ;;  %v471_v21 = vmul.f32 %v466_v6, %v451_v9  ;;  %v472_v22 = vmul.f32 %v470_v7, %v451_v9 }
 0x138   : > { %v421_v18 = vadd.f32 %v419_v12, %v395_v10  ;;  %v422_v20 = vadd.f32 %v420_v13, %v396_v11 }
 0x13a   : > { %v447_v23 = vadd.f32 %v445_v15, %v421_v18  ;;  %v448_v24 = vadd.f32 %v446_v16, %v422_v20  ;;  %v549_v12 = vpop.permute.xlu1 %548  ;;  %v574_v18 = vpop.permute.xlu0 %573 }
 0x13c   : > { %v473_v31 = vadd.f32 %v471_v21, %v447_v23  ;;  %v474_v32 = vadd.f32 %v472_v22, %v448_v24 }
 0x13e   : > { %v488_v35 = vcombine.low %v473_v31, %v474_v32  ;;  %v507_v33 = vmul.f32 0.0, %v473_v31  ;;  %v508_v38 = vmul.f32 0.0, %v474_v32 }
 0x140   : > { %v490_v42 = vsub.f32 %v2647_v47, %v488_v35  ;;  %v500_v43 = vsub.f32 %v2709_v34, %v488_v35  ;;  %v537_v47 = vsel %vm535_vm5, %v536_v37, %v534_v41  ;;  %v512_v62 = vadd.f32 %v507_v33, %v2709_v34  ;;  %v2040_v33 = vpop.eup %2039 }
 0x141   : > { %v513_v63 = vadd.f32 %v2722_v54, %v508_v38  ;;  %v539_v0 = vsel %vm2728_vm6, %v537_v47, %v538_v56 }
 0x142   : > { %v492_v45 = vmul.f32 %v491_v40, %v490_v42  ;;  %v501_v58 = vmul.f32 %v500_v43, %v499_v36  ;;  %v542_v8 = vmul.f32 %v1867_v61, %v539_v0  ;;  %v626_v43 = vpop.permute.xlu0 %625  ;;  %v704_v61 = vmul.f32 %v2040_v33, %v2738_v1 }
 0x143   : > { %v525_v9 = vcombine.low %v512_v62, %v513_v63  ;;  %v656_v62 = vstv %s2759_s30  ;;  %s2939_s30 = sld [smem:[#allocation2 + $0x86]] }
 0x144   : > { %v494_v59 = vcombine.high %v492_v45, %v492_v45  ;;  %v503_v60 = vcombine.high %v501_v58, %v501_v58  ;;  %v496_v2 = vadd.f32 %v492_v45, %v473_v31  ;;  %v505_v4 = vadd.f32 %v501_v58, %v473_v31  ;;  %v600_v31 = vpop.permute.xlu1 %599 }
 0x145   : > { %vm659_vm10 = vcmp.ge.f32.partialorder %v656_v62, %v2616_v25  ;;  %vm657_vm13 = vcmp.lt.f32.partialorder %v656_v62, %v2616_v25 }
 0x146   : > { %v497_v3 = vadd.f32 %v494_v59, %v474_v32  ;;  %v506_v5 = vadd.f32 %v503_v60, %v474_v32  ;;  %v673_v60 = vstv %s2751_s29  ;;  %vm2787_vm12 = vmand %vm344_vm0, %vm659_vm10  ;;  %s2933_s29 = sld [smem:[#allocation2 + $0x5]] }
 0x147   : > { %vm658_vm14 = vmand %vm344_vm0, %vm657_vm13 }
 0x148   : > { %v516_v6 = vcombine.low %v505_v4, %v506_v5  ;;  %v520_v7 = vcombine.low %v496_v2, %v497_v3  ;;  %v674_v3 = vmul.f32 %v673_v60, %v2700_v28  ;;  %v708_v4 = vand.u32 2147483648, %v2738_v1 }
 0x149   : > { %v872_v5 = vstv %s2765_s6  ;;  %s2941_s6 = sld [smem:[#allocation2 + $0x185]] }
 0x14a   : > { %v522_v10 = vsel %vm483_vm8, %v516_v6, %v520_v7  ;;  %v666_v6 = vstv %s2767_s14  ;;  %v706_v7 = vsel %vm705_vm9, %v2738_v1, %v704_v61  ;;  %s2943_s14 = sld [smem:[#allocation2 + $0x205]] }
 0x14b   : > { %v527_v11 = vsel %vm2728_vm6, %v525_v9, %v522_v10 }
 0x14c   : > { %v543_v13 = vadd.f32 %v542_v8, %v527_v11 }
 0x14e   : > { %v579_v14 = vrot.slane %v543_v13, %v2649_v48  ;;  %v583_v15 = vrot.slane %v543_v13, %v2651_v49  ;;  %v555_v16 = vrot.slane %v543_v13, %v2641_v44  ;;  %v559_v17 = vrot.slane %v543_v13, %v2645_v46 }
 0x14f   : > { %v605_v20 = vrot.slane %v543_v13, %v2653_v50  ;;  %v609_v21 = vrot.slane %v543_v13, %v2655_v51  ;;  %v631_v22 = vrot.slane %v543_v13, %v2657_v52  ;;  %v635_v23 = vrot.slane %v543_v13, %v2659_v53 }
 0x150   : > { %v589_v24 = vrot.slane %v579_v14, %v2649_v48  ;;  %v593_v27 = vrot.slane %v583_v15, %v2649_v48  ;;  %v565_v29 = vrot.slane %v555_v16, %v2641_v44  ;;  %v569_v30 = vrot.slane %v559_v17, %v2641_v44 }
 0x151   : > { %v615_v32 = vrot.slane %v605_v20, %v2653_v50  ;;  %v619_v35 = vrot.slane %v609_v21, %v2653_v50  ;;  %v641_v36 = vrot.slane %v631_v22, %v2657_v52  ;;  %v645_v37 = vrot.slane %v635_v23, %v2657_v52  ;;  %v1874_v20 = vld [vmem:[%s2563_s13 + $0x10] sm:$0xff] }
 0x152   : > { %v594_v39 = vmul.f32 %v589_v24, %v574_v18  ;;  %v595_v40 = vmul.f32 %v593_v27, %v574_v18  ;;  %v570_v41 = vmul.f32 %v565_v29, %v549_v12  ;;  %v571_v42 = vmul.f32 %v569_v30, %v549_v12 }
 0x153   : > { %v620_v56 = vmul.f32 %v615_v32, %v600_v31  ;;  %v621_v57 = vmul.f32 %v619_v35, %v600_v31  ;;  %v646_v47 = vmul.f32 %v641_v36, %v626_v43  ;;  %v647_v59 = vmul.f32 %v645_v37, %v626_v43  ;;  %v721_v32 = vpop.permute.xlu1 %720 }
 0x154   : > { %v596_v38 = vadd.f32 %v594_v39, %v570_v41  ;;  %v597_v55 = vadd.f32 %v595_v40, %v571_v42  ;;  %v873_v12 = vsub.f32 %v872_v5, %v2620_v26  ;;  %v710_v14 = vstv %s2769_s17  ;;  %s2984_s17 = sld [smem:[#allocation2 + $0x106]] }
 0x155   : > { %v709_v18 = vsel %vm707_vm11, %v708_v4, %v706_v7 }
 0x156   : > { %v622_v45 = vadd.f32 %v620_v56, %v596_v38  ;;  %v623_v58 = vadd.f32 %v621_v57, %v597_v55  ;;  %v711_v23 = vsel %vm2787_vm12, %v709_v18, %v710_v14  ;;  %v2797_v24 = vmax.f32 %v873_v12, 0.0 }
 0x157   : > { %v714_v37 = vmul.f32 %v1874_v20, %v711_v23  ;;  %v746_v43 = vpop.permute.xlu1 %745 }
 0x158   : > { %v648_v63 = vadd.f32 %v646_v47, %v622_v45  ;;  %v649_v0 = vadd.f32 %v647_v59, %v623_v58  ;;  %2041 = vrsqrt.f32 %v2797_v24  ;;  %vm877_vm15 = vcmp.eq.f32.partialorder %v2797_v24, inf }
 0x159   : > { %vm879_vm2 = vcmp.eq.f32.partialorder %v2797_v24, 0.0 }
 0x15a   : > { %v663_v2 = vcombine.low %v648_v63, %v649_v0  ;;  %v682_v10 = vmul.f32 0.0, %v648_v63  ;;  %v683_v11 = vmul.f32 0.0, %v649_v0 }
 0x15c   : > { %v665_v8 = vsub.f32 %v543_v13, %v663_v2  ;;  %v675_v9 = vsub.f32 %v2709_v34, %v663_v2  ;;  %v684_v21 = vadd.f32 %v682_v10, %v2709_v34  ;;  %v685_v22 = vadd.f32 %v683_v11, %v2722_v54  ;;  %v772_v2 = vpop.permute.xlu0 %771 }
 0x15e   : > { %v667_v16 = vmul.f32 %v666_v6, %v665_v8  ;;  %v676_v17 = vmul.f32 %v675_v9, %v674_v3  ;;  %v697_v39 = vcombine.low %v684_v21, %v685_v22  ;;  %v798_v9 = vpop.permute.xlu1 %797  ;;  %v828_v21 = vstv %s2818_s25  ;;  %s2998_s25 = sld [smem:[#allocation2 + $0x186]] }
 0x15f   : > { %vm831_vm1 = vcmp.ge.f32.partialorder %v828_v21, %v2616_v25  ;;  %vm829_vm4 = vcmp.lt.f32.partialorder %v828_v21, %v2616_v25 }
 0x160   : > { %v669_v1 = vcombine.high %v667_v16, %v667_v16  ;;  %v678_v13 = vcombine.high %v676_v17, %v676_v17  ;;  %v671_v27 = vadd.f32 %v667_v16, %v648_v63  ;;  %v680_v30 = vadd.f32 %v676_v17, %v648_v63  ;;  %vm2842_vm3 = vmand %vm344_vm0, %vm831_vm1 }
 0x161   : > { %vm830_vm5 = vmand %vm344_vm0, %vm829_vm4 }
 0x162   : > { %v672_v29 = vadd.f32 %v669_v1, %v649_v0  ;;  %v681_v31 = vadd.f32 %v678_v13, %v649_v0  ;;  %v2042_v10 = vpop.eup %2041  ;;  %v845_v13 = vstv %s2810_s3  ;;  %s2992_s3 = sld [smem:[#allocation2 + $0x6]] }
 0x163   : > { %v876_v20 = vmul.f32 %v2042_v10, %v2797_v24 }
 0x164   : > { %v688_v35 = vcombine.low %v680_v30, %v681_v31  ;;  %v692_v36 = vcombine.low %v671_v27, %v672_v29  ;;  %v846_v29 = vmul.f32 %v845_v13, %v2700_v28  ;;  %v880_v30 = vand.u32 2147483648, %v2797_v24 }
 0x165   : > { %v838_v31 = vstv %s2824_s26  ;;  %s1904_s26 = sld [smem:[#allocation2 + $0x87]] }
 0x166   : > { %v694_v40 = vsel %vm658_vm14, %v688_v35, %v692_v36 }
 0x167   : > { %v699_v41 = vsel %vm2787_vm12, %v697_v39, %v694_v40 }
 0x168   : > { %v715_v42 = vadd.f32 %v714_v37, %v699_v41  ;;  %v1044_v37 = vstv %s1883_s8  ;;  %v882_v41 = vstv %s2826_s15  ;;  %s3000_s8 = sld [smem:[#allocation2 + $0x206]]  ;;  %s3044_s15 = sld [smem:[#allocation2 + $0x107]] }
 0x16a   : > { %v727_v33 = vrot.slane %v715_v42, %v2641_v44  ;;  %v731_v38 = vrot.slane %v715_v42, %v2645_v46  ;;  %v751_v55 = vrot.slane %v715_v42, %v2649_v48  ;;  %v755_v56 = vrot.slane %v715_v42, %v2651_v49 }
 0x16b   : > { %v803_v57 = vrot.slane %v715_v42, %v2657_v52  ;;  %v807_v45 = vrot.slane %v715_v42, %v2659_v53  ;;  %v777_v58 = vrot.slane %v715_v42, %v2653_v50  ;;  %v781_v47 = vrot.slane %v715_v42, %v2655_v51 }
 0x16c   : > { %v737_v59 = vrot.slane %v727_v33, %v2641_v44  ;;  %v741_v60 = vrot.slane %v731_v38, %v2641_v44  ;;  %v761_v61 = vrot.slane %v751_v55, %v2649_v48  ;;  %v765_v62 = vrot.slane %v755_v56, %v2649_v48 }
 0x16d   : > { %v813_v63 = vrot.slane %v803_v57, %v2657_v52  ;;  %v817_v0 = vrot.slane %v807_v45, %v2657_v52  ;;  %v787_v3 = vrot.slane %v777_v58, %v2653_v50  ;;  %v791_v4 = vrot.slane %v781_v47, %v2653_v50  ;;  %v1881_v57 = vld [vmem:[%s2563_s13 + $0x18] sm:$0xff] }
 0x16e   : > { %v742_v5 = vmul.f32 %v737_v59, %v721_v32  ;;  %v743_v6 = vmul.f32 %v741_v60, %v721_v32  ;;  %v766_v7 = vmul.f32 %v761_v61, %v746_v43  ;;  %v767_v8 = vmul.f32 %v765_v62, %v746_v43 }
 0x16f   : > { %v792_v14 = vmul.f32 %v787_v3, %v772_v2  ;;  %v793_v15 = vmul.f32 %v791_v4, %v772_v2  ;;  %v818_v16 = vmul.f32 %v813_v63, %v798_v9  ;;  %v819_v17 = vmul.f32 %v817_v0, %v798_v9  ;;  %v893_v4 = vpop.permute.xlu1 %892 }
 0x170   : > { %v768_v11 = vadd.f32 %v766_v7, %v742_v5  ;;  %v769_v12 = vadd.f32 %v767_v8, %v743_v6  ;;  %v878_v32 = vsel %vm877_vm15, %v2797_v24, %v876_v20  ;;  %v1045_v56 = vsub.f32 %v1044_v37, %v2620_v26  ;;  %v918_v20 = vpop.permute.xlu0 %917 }
 0x171   : > { %v881_v55 = vsel %vm879_vm2, %v880_v30, %v878_v32 }
 0x172   : > { %v794_v18 = vadd.f32 %v792_v14, %v768_v11  ;;  %v795_v1 = vadd.f32 %v793_v15, %v769_v12  ;;  %v883_v47 = vsel %vm2842_vm3, %v881_v55, %v882_v41  ;;  %v2855_v63 = vmax.f32 %v1045_v56, 0.0 }
 0x173   : > { %v886_v3 = vmul.f32 %v1881_v57, %v883_v47  ;;  %v944_v11 = vpop.permute.xlu1 %943 }
 0x174   : > { %v820_v22 = vadd.f32 %v818_v16, %v794_v18  ;;  %v821_v23 = vadd.f32 %v819_v17, %v795_v1  ;;  %2043 = vrsqrt.f32 %v2855_v63  ;;  %vm1049_vm6 = vcmp.eq.f32.partialorder %v2855_v63, inf }
 0x175   : > { %vm1051_vm8 = vcmp.eq.f32.partialorder %v2855_v63, 0.0 }
 0x176   : > { %v835_v27 = vcombine.low %v820_v22, %v821_v23  ;;  %v854_v39 = vmul.f32 0.0, %v820_v22  ;;  %v855_v40 = vmul.f32 0.0, %v821_v23 }
 0x177   : > { %v970_v37 = vpop.permute.xlu1 %969 }
 0x178   : > { %v837_v35 = vsub.f32 %v715_v42, %v835_v27  ;;  %v847_v36 = vsub.f32 %v2709_v34, %v835_v27  ;;  %v856_v45 = vadd.f32 %v854_v39, %v2709_v34  ;;  %v857_v58 = vadd.f32 %v855_v40, %v2722_v54 }
 0x17a   : > { %v839_v33 = vmul.f32 %v838_v31, %v837_v35  ;;  %v848_v38 = vmul.f32 %v847_v36, %v846_v29  ;;  %v869_v5 = vcombine.low %v856_v45, %v857_v58  ;;  %v1000_v45 = vstv %s2874_s28  ;;  %s1906_s28 = sld [smem:[#allocation2 + $0x187]] }
 0x17b   : > { %vm1003_vm7 = vcmp.ge.f32.partialorder %v1000_v45, %v2616_v25  ;;  %vm1001_vm10 = vcmp.lt.f32.partialorder %v1000_v45, %v2616_v25 }
 0x17c   : > { %v841_v24 = vcombine.high %v839_v33, %v839_v33  ;;  %v850_v42 = vcombine.high %v848_v38, %v848_v38  ;;  %v843_v59 = vadd.f32 %v839_v33, %v820_v22  ;;  %v852_v61 = vadd.f32 %v848_v38, %v820_v22  ;;  %vm2902_vm9 = vmand %vm344_vm0, %vm1003_vm7 }
 0x17d   : > { %vm1002_vm11 = vmand %vm344_vm0, %vm1001_vm10 }
 0x17e   : > { %v844_v60 = vadd.f32 %v841_v24, %v821_v23  ;;  %v853_v62 = vadd.f32 %v850_v42, %v821_v23  ;;  %v2044_v39 = vpop.eup %2043  ;;  %v1017_v42 = vstv %s2870_s24  ;;  %s3048_s24 = sld [smem:[#allocation2 + $0x7]] }
 0x17f   : > { %v1048_v57 = vmul.f32 %v2044_v39, %v2855_v63 }
 0x180   : > { %v860_v0 = vcombine.low %v852_v61, %v853_v62  ;;  %v864_v2 = vcombine.low %v843_v59, %v844_v60  ;;  %v1018_v60 = vmul.f32 %v1017_v42, %v2700_v28  ;;  %v1052_v61 = vand.u32 2147483648, %v2855_v63 }
 0x181   : > { %v1216_v62 = vstv %s2880_s27  ;;  %s3054_s27 = sld [smem:[#allocation2 + $0x207]] }
 0x182   : > { %v866_v6 = vsel %vm830_vm5, %v860_v0, %v864_v2  ;;  %v1010_v0 = vstv %s2882_s23  ;;  %v1050_v2 = vsel %vm1049_vm6, %v2855_v63, %v1048_v57  ;;  %s340_s23 = scalar_lea.vmem [#allocation12], %s2553_s16 }
 0x183   : > { %v871_v7 = vsel %vm2842_vm3, %v869_v5, %v866_v6 }
 0x184   : > { %v887_v8 = vadd.f32 %v886_v3, %v871_v7  ;;  %v1217_v7 = vsub.f32 %v1216_v62, %v2620_v26 }
 0x186   : > { %v899_v9 = vrot.slane %v887_v8, %v2641_v44  ;;  %v903_v10 = vrot.slane %v887_v8, %v2645_v46  ;;  %v949_v12 = vrot.slane %v887_v8, %v2653_v50  ;;  %v953_v14 = vrot.slane %v887_v8, %v2655_v51 }
 0x187   : > { %v975_v15 = vrot.slane %v887_v8, %v2657_v52  ;;  %v979_v16 = vrot.slane %v887_v8, %v2659_v53  ;;  %v923_v17 = vrot.slane %v887_v8, %v2649_v48  ;;  %v927_v18 = vrot.slane %v887_v8, %v2651_v49 }
 0x188   : > { %v909_v1 = vrot.slane %v899_v9, %v2641_v44  ;;  %v913_v13 = vrot.slane %v903_v10, %v2641_v44  ;;  %v959_v21 = vrot.slane %v949_v12, %v2653_v50  ;;  %v963_v22 = vrot.slane %v953_v14, %v2653_v50 }
 0x189   : > { %v933_v23 = vrot.slane %v923_v17, %v2649_v48  ;;  %v937_v27 = vrot.slane %v927_v18, %v2649_v48  ;;  %v985_v31 = vrot.slane %v975_v15, %v2657_v52  ;;  %v989_v32 = vrot.slane %v979_v16, %v2657_v52  ;;  %v1888_v15 = vld [vmem:[%s2563_s13 + $0x20] sm:$0xff] }
 0x18a   : > { %v914_v29 = vmul.f32 %v909_v1, %v893_v4  ;;  %v915_v30 = vmul.f32 %v913_v13, %v893_v4  ;;  %v964_v40 = vmul.f32 %v959_v21, %v944_v11  ;;  %v965_v41 = vmul.f32 %v963_v22, %v944_v11 }
 0x18b   : > { %v938_v35 = vmul.f32 %v933_v23, %v918_v20  ;;  %v939_v36 = vmul.f32 %v937_v27, %v918_v20  ;;  %v990_v38 = vmul.f32 %v985_v31, %v970_v37  ;;  %v991_v55 = vmul.f32 %v989_v32, %v970_v37  ;;  %v1065_v37 = vpop.permute.xlu0 %1064 }
 0x18c   : > { %v1054_v9 = vstv %s2884_s11  ;;  %v1053_v14 = vsel %vm1051_vm8, %v1052_v61, %v1050_v2  ;;  %v2912_v1 = vmax.f32 %v1217_v7, 0.0  ;;  %s1702_s11 = sshll.u32 %s340_s23, 4  ;;  %s3106_s11 = int_to_ptr.vmem [resolvable:$true] %s1702_s11 }
 0x18d   : > { %v940_v43 = vadd.f32 %v938_v35, %v914_v29  ;;  %v941_v33 = vadd.f32 %v939_v36, %v915_v30  ;;  %v1055_v18 = vsel %vm2902_vm9, %v1053_v14, %v1054_v9  ;;  %v1090_v35 = vpop.permute.xlu1 %1089 }
 0x18e   : > { %v1058_v29 = vmul.f32 %v1888_v15, %v1055_v18  ;;  %2045 = vrsqrt.f32 %v2912_v1  ;;  %vm1221_vm12 = vcmp.eq.f32.partialorder %v2912_v1, inf  ;;  %vm1223_vm14 = vcmp.eq.f32.partialorder %v2912_v1, 0.0 }
 0x18f   : > { %v966_v56 = vadd.f32 %v964_v40, %v940_v43  ;;  %v967_v24 = vadd.f32 %v965_v41, %v941_v33 }
 0x191   : > { %v992_v58 = vadd.f32 %v990_v38, %v966_v56  ;;  %v993_v47 = vadd.f32 %v991_v55, %v967_v24 }
 0x193   : > { %v1007_v59 = vcombine.low %v992_v58, %v993_v47  ;;  %v1026_v5 = vmul.f32 0.0, %v992_v58  ;;  %v1027_v6 = vmul.f32 0.0, %v993_v47 }
 0x195   : > { %v1009_v3 = vsub.f32 %v887_v8, %v1007_v59  ;;  %v1019_v4 = vsub.f32 %v2709_v34, %v1007_v59  ;;  %v1028_v16 = vadd.f32 %v1026_v5, %v2709_v34  ;;  %v1029_v17 = vadd.f32 %v1027_v6, %v2722_v54 }
 0x197   : > { %v1011_v11 = vmul.f32 %v1010_v0, %v1009_v3  ;;  %v1020_v12 = vmul.f32 %v1019_v4, %v1018_v60  ;;  %v1041_v30 = vcombine.low %v1028_v16, %v1029_v17  ;;  %v1142_v4 = vpop.permute.xlu0 %1141  ;;  %v1172_v16 = vstv %s2933_s29 }
 0x198   : > { %v2046_v5 = vpop.eup %2045  ;;  %vm1175_vm13 = vcmp.ge.f32.partialorder %v1172_v16, %v2616_v25  ;;  %vm1173_vm1 = vcmp.lt.f32.partialorder %v1172_v16, %v2616_v25 }
 0x199   : > { %v1013_v63 = vcombine.high %v1011_v11, %v1011_v11  ;;  %v1022_v8 = vcombine.high %v1020_v12, %v1020_v12  ;;  %v1015_v13 = vadd.f32 %v1011_v11, %v992_v58  ;;  %v1024_v21 = vadd.f32 %v1020_v12, %v992_v58  ;;  %v1116_v58 = vpop.permute.xlu1 %1115  ;;  %vm2961_vm15 = vmand %vm344_vm0, %vm1175_vm13 }
 0x19a   : > { %v1220_v15 = vmul.f32 %v2046_v5, %v2912_v1  ;;  %vm1174_vm2 = vmand %vm344_vm0, %vm1173_vm1 }
 0x19b   : > { %v1016_v20 = vadd.f32 %v1013_v63, %v993_v47  ;;  %v1025_v22 = vadd.f32 %v1022_v8, %v993_v47  ;;  %v1189_v8 = vstv %s2925_s2 }
 0x19d   : > { %v1032_v23 = vcombine.low %v1024_v21, %v1025_v22  ;;  %v1036_v27 = vcombine.low %v1015_v13, %v1016_v20  ;;  %v1190_v20 = vmul.f32 %v1189_v8, %v2700_v28  ;;  %v1224_v21 = vand.u32 2147483648, %v2912_v1 }
 0x19e   : > { %v1388_v22 = vstv %s2939_s30 }
 0x19f   : > { %v1038_v31 = vsel %vm1002_vm11, %v1032_v23, %v1036_v27  ;;  %v1182_v23 = vstv %s2941_s6  ;;  %v1222_v27 = vsel %vm1221_vm12, %v2912_v1, %v1220_v15  ;;  %s1688_s6 = scalar_lea.sflag [#allocation4], %s2550_s10 }
 0x1a0   : > { %v1043_v32 = vsel %vm2902_vm9, %v1041_v30, %v1038_v31 }
 0x1a1   : > { %v1059_v36 = vadd.f32 %v1058_v29, %v1043_v32 }
 0x1a3   : > { %v1095_v39 = vrot.slane %v1059_v36, %v2649_v48  ;;  %v1099_v40 = vrot.slane %v1059_v36, %v2651_v49  ;;  %v1071_v41 = vrot.slane %v1059_v36, %v2641_v44  ;;  %v1075_v43 = vrot.slane %v1059_v36, %v2645_v46 }
 0x1a4   : > { %v1121_v33 = vrot.slane %v1059_v36, %v2653_v50  ;;  %v1125_v38 = vrot.slane %v1059_v36, %v2655_v51  ;;  %v1147_v55 = vrot.slane %v1059_v36, %v2657_v52  ;;  %v1151_v56 = vrot.slane %v1059_v36, %v2659_v53 }
 0x1a5   : > { %v1105_v24 = vrot.slane %v1095_v39, %v2649_v48  ;;  %v1109_v42 = vrot.slane %v1099_v40, %v2649_v48  ;;  %v1081_v57 = vrot.slane %v1071_v41, %v2641_v44  ;;  %v1085_v45 = vrot.slane %v1075_v43, %v2641_v44 }
 0x1a6   : > { %v1131_v47 = vrot.slane %v1121_v33, %v2653_v50  ;;  %v1135_v59 = vrot.slane %v1125_v38, %v2653_v50  ;;  %v1157_v60 = vrot.slane %v1147_v55, %v2657_v52  ;;  %v1161_v61 = vrot.slane %v1151_v56, %v2657_v52  ;;  %v1895_v33 = vld [vmem:[%s2563_s13 + $0x28] sm:$0xff] }
 0x1a7   : > { %v1110_v62 = vmul.f32 %v1105_v24, %v1090_v35  ;;  %v1111_v0 = vmul.f32 %v1109_v42, %v1090_v35  ;;  %v1086_v2 = vmul.f32 %v1081_v57, %v1065_v37  ;;  %v1087_v3 = vmul.f32 %v1085_v45, %v1065_v37 }
 0x1a8   : > { %v1136_v9 = vmul.f32 %v1131_v47, %v1116_v58  ;;  %v1137_v10 = vmul.f32 %v1135_v59, %v1116_v58  ;;  %v1162_v14 = vmul.f32 %v1157_v60, %v1142_v4  ;;  %v1163_v63 = vmul.f32 %v1161_v61, %v1142_v4  ;;  %v1237_v47 = vpop.permute.xlu1 %1236 }
 0x1a9   : > { %v1112_v6 = vadd.f32 %v1110_v62, %v1086_v2  ;;  %v1113_v7 = vadd.f32 %v1111_v0, %v1087_v3  ;;  %v1389_v35 = vsub.f32 %v1388_v22, %v2620_v26  ;;  %v1226_v37 = vstv %s2943_s14  ;;  %s2182_s14 = scalar_lea.vmem %s3106_s11, 128 }
 0x1aa   : > { %v1225_v43 = vsel %vm1223_vm14, %v1224_v21, %v1222_v27  ;;  %p2183_p9 = scmp.ne.s32.totalorder %s3106_s11, %s2182_s14 }
 0x1ab   : > { %v1138_v11 = vadd.f32 %v1136_v9, %v1112_v6  ;;  %v1139_v12 = vadd.f32 %v1137_v10, %v1113_v7  ;;  %v1227_v56 = vsel %vm2961_vm15, %v1225_v43, %v1226_v37  ;;  %v2971_v24 = vmax.f32 %v1389_v35, 0.0 }
 0x1ac   : > { %v1230_v61 = vmul.f32 %v1895_v33, %v1227_v56  ;;  %v1262_v4 = vpop.permute.xlu1 %1261  ;;  %p2184_p10 = pnand %p2183_p9, %p3200_p0 }
 0x1ad   : > { %v1164_v17 = vadd.f32 %v1162_v14, %v1138_v11  ;;  %v1165_v18 = vadd.f32 %v1163_v63, %v1139_v12  ;;  %2047 = vrsqrt.f32 %v2971_v24  ;;  %vm1393_vm3 = vcmp.eq.f32.partialorder %v2971_v24, inf }
 0x1ae   : > { %vm1395_vm5 = vcmp.eq.f32.partialorder %v2971_v24, 0.0  ;;  %p2185_p2 = pneg %p2184_p10 }
 0x1af   : > { %v1179_v13 = vcombine.low %v1164_v17, %v1165_v18  ;;  %v1198_v31 = vmul.f32 0.0, %v1164_v17  ;;  %v1199_v32 = vmul.f32 0.0, %v1165_v18 }
 0x1b1   : > { %v1181_v29 = vsub.f32 %v1059_v36, %v1179_v13  ;;  %v1191_v30 = vsub.f32 %v2709_v34, %v1179_v13  ;;  %v1200_v38 = vadd.f32 %v1198_v31, %v2709_v34  ;;  %v1201_v55 = vadd.f32 %v1199_v32, %v2722_v54  ;;  %v1288_v13 = vpop.permute.xlu0 %1287 }
 0x1b3   : > { %v1183_v40 = vmul.f32 %v1182_v23, %v1181_v29  ;;  %v1192_v41 = vmul.f32 %v1191_v30, %v1190_v20  ;;  %v1213_v62 = vcombine.low %v1200_v38, %v1201_v55  ;;  %v1314_v30 = vpop.permute.xlu1 %1313  ;;  %v1344_v38 = vstv %s2992_s3 }
 0x1b4   : > { %vm1347_vm4 = vcmp.ge.f32.partialorder %v1344_v38, %v2616_v25  ;;  %vm1345_vm7 = vcmp.lt.f32.partialorder %v1344_v38, %v2616_v25 }
 0x1b5   : > { %v1185_v1 = vcombine.high %v1183_v40, %v1183_v40  ;;  %v1194_v36 = vcombine.high %v1192_v41, %v1192_v41  ;;  %v1187_v42 = vadd.f32 %v1183_v40, %v1164_v17  ;;  %v1196_v45 = vadd.f32 %v1192_v41, %v1164_v17  ;;  %vm3016_vm6 = vmand %vm344_vm0, %vm1347_vm4 }
 0x1b6   : > { %vm1346_vm8 = vmand %vm344_vm0, %vm1345_vm7 }
 0x1b7   : > { %v1188_v57 = vadd.f32 %v1185_v1, %v1165_v18  ;;  %v1197_v58 = vadd.f32 %v1194_v36, %v1165_v18  ;;  %v2048_v31 = vpop.eup %2047  ;;  %v1361_v36 = vstv %s2984_s17 }
 0x1b8   : > { %v1392_v33 = vmul.f32 %v2048_v31, %v2971_v24 }
 0x1b9   : > { %v1204_v59 = vcombine.low %v1196_v45, %v1197_v58  ;;  %v1208_v60 = vcombine.low %v1187_v42, %v1188_v57  ;;  %v1362_v57 = vmul.f32 %v1361_v36, %v2700_v28  ;;  %v1396_v45 = vand.u32 2147483648, %v2971_v24  ;;  %v1434_v36 = vpop.permute.xlu0 %1433 }
 0x1ba   : > { %v1354_v58 = vstv %s2998_s25 }
 0x1bb   : > { %v1210_v0 = vsel %vm1174_vm2, %v1204_v59, %v1208_v60 }
 0x1bc   : > { %v1215_v2 = vsel %vm2961_vm15, %v1213_v62, %v1210_v0 }
 0x1bd   : > { %v1231_v3 = vadd.f32 %v1230_v61, %v1215_v2  ;;  %v1560_v61 = vstv %s1904_s26  ;;  %v1398_v2 = vstv %s3000_s8 }
 0x1bf   : > { %v1243_v5 = vrot.slane %v1231_v3, %v2641_v44  ;;  %v1247_v6 = vrot.slane %v1231_v3, %v2645_v46  ;;  %v1267_v7 = vrot.slane %v1231_v3, %v2649_v48  ;;  %v1271_v9 = vrot.slane %v1231_v3, %v2651_v49 }
 0x1c0   : > { %v1319_v10 = vrot.slane %v1231_v3, %v2657_v52  ;;  %v1323_v11 = vrot.slane %v1231_v3, %v2659_v53  ;;  %v1293_v12 = vrot.slane %v1231_v3, %v2653_v50  ;;  %v1297_v14 = vrot.slane %v1231_v3, %v2655_v51 }
 0x1c1   : > { %v1253_v63 = vrot.slane %v1243_v5, %v2641_v44  ;;  %v1257_v8 = vrot.slane %v1247_v6, %v2641_v44  ;;  %v1277_v15 = vrot.slane %v1267_v7, %v2649_v48  ;;  %v1281_v16 = vrot.slane %v1271_v9, %v2649_v48 }
 0x1c2   : > { %v1329_v17 = vrot.slane %v1319_v10, %v2657_v52  ;;  %v1333_v18 = vrot.slane %v1323_v11, %v2657_v52  ;;  %v1303_v20 = vrot.slane %v1293_v12, %v2653_v50  ;;  %v1307_v21 = vrot.slane %v1297_v14, %v2653_v50  ;;  %v1902_v10 = vld [vmem:[%s2563_s13 + $0x30] sm:$0xff] }
 0x1c3   : > { %v1258_v22 = vmul.f32 %v1253_v63, %v1237_v47  ;;  %v1259_v23 = vmul.f32 %v1257_v8, %v1237_v47  ;;  %v1282_v27 = vmul.f32 %v1277_v15, %v1262_v4  ;;  %v1283_v29 = vmul.f32 %v1281_v16, %v1262_v4 }
 0x1c4   : > { %v1308_v37 = vmul.f32 %v1303_v20, %v1288_v13  ;;  %v1309_v39 = vmul.f32 %v1307_v21, %v1288_v13  ;;  %v1334_v40 = vmul.f32 %v1329_v17, %v1314_v30  ;;  %v1335_v41 = vmul.f32 %v1333_v18, %v1314_v30  ;;  %v1409_v20 = vpop.permute.xlu1 %1408 }
 0x1c5   : > { %v1284_v32 = vadd.f32 %v1282_v27, %v1258_v22  ;;  %v1285_v35 = vadd.f32 %v1283_v29, %v1259_v23  ;;  %v1394_v47 = vsel %vm1393_vm3, %v2971_v24, %v1392_v33  ;;  %v1561_v9 = vsub.f32 %v1560_v61, %v2620_v26 }
 0x1c6   : > { %v1397_v7 = vsel %vm1395_vm5, %v1396_v45, %v1394_v47 }
 0x1c7   : > { %v1310_v43 = vadd.f32 %v1308_v37, %v1284_v32  ;;  %v1311_v1 = vadd.f32 %v1309_v39, %v1285_v35  ;;  %v1399_v14 = vsel %vm3016_vm6, %v1397_v7, %v1398_v2  ;;  %v3029_v26 = vmax.f32 %v1561_v9, 0.0 }
 0x1c8   : > { %v1402_v13 = vmul.f32 %v1902_v10, %v1399_v14  ;;  %v1460_v31 = vpop.permute.xlu1 %1459  ;;  %v1516_v10 = vstv %s3048_s24 }
 0x1c9   : > { %v1336_v55 = vadd.f32 %v1334_v40, %v1310_v43  ;;  %v1337_v56 = vadd.f32 %v1335_v41, %v1311_v1  ;;  %2049 = vrsqrt.f32 %v3029_v26  ;;  %vm1565_vm9 = vcmp.eq.f32.partialorder %v3029_v26, inf }
 0x1ca   : > { %vm1519_vm10 = vcmp.ge.f32.partialorder %v1516_v10, %v2616_v25  ;;  %vm1567_vm11 = vcmp.eq.f32.partialorder %v3029_v26, 0.0  ;;  %vm1517_vm13 = vcmp.lt.f32.partialorder %v1516_v10, %v2616_v25 }
 0x1cb   : > { %v1351_v42 = vcombine.low %v1336_v55, %v1337_v56  ;;  %v1370_v62 = vmul.f32 0.0, %v1336_v55  ;;  %v1371_v0 = vmul.f32 0.0, %v1337_v56  ;;  %vm3069_vm12 = vmand %vm344_vm0, %vm1519_vm10 }
 0x1cc   : > { %vm1518_vm14 = vmand %vm344_vm0, %vm1517_vm13 }
 0x1cd   : > { %v1353_v59 = vsub.f32 %v1231_v3, %v1351_v42  ;;  %v1363_v60 = vsub.f32 %v2709_v34, %v1351_v42  ;;  %v1372_v11 = vadd.f32 %v1370_v62, %v2709_v34  ;;  %v1373_v12 = vadd.f32 %v1371_v0, %v2722_v54 }
 0x1cf   : > { %v1355_v5 = vmul.f32 %v1354_v58, %v1353_v59  ;;  %v1364_v6 = vmul.f32 %v1363_v60, %v1362_v57  ;;  %v1385_v21 = vcombine.low %v1372_v11, %v1373_v12  ;;  %v1486_v60 = vpop.permute.xlu1 %1485 }
 0x1d1   : > { %v1357_v24 = vcombine.high %v1355_v5, %v1355_v5  ;;  %v1366_v3 = vcombine.high %v1364_v6, %v1364_v6  ;;  %v1359_v63 = vadd.f32 %v1355_v5, %v1336_v55  ;;  %v1368_v15 = vadd.f32 %v1364_v6, %v1336_v55 }
 0x1d3   : > { %v1360_v8 = vadd.f32 %v1357_v24, %v1337_v56  ;;  %v1369_v16 = vadd.f32 %v1366_v3, %v1337_v56  ;;  %v2050_v61 = vpop.eup %2049  ;;  %v1533_v24 = vstv %s3044_s15 }
 0x1d4   : > { %v1564_v3 = vmul.f32 %v2050_v61, %v3029_v26 }
 0x1d5   : > { %v1376_v17 = vcombine.low %v1368_v15, %v1369_v16  ;;  %v1380_v18 = vcombine.low %v1359_v63, %v1360_v8  ;;  %v1534_v63 = vmul.f32 %v1533_v24, %v2700_v28  ;;  %v1568_v8 = vand.u32 2147483648, %v3029_v26 }
 0x1d6   : > { %v1526_v15 = vstv %s1906_s28  ;;  %v1566_v16 = vsel %vm1565_vm9, %v3029_v26, %v1564_v3  ;;  %v1909_v26 = vld [vmem:[%s2563_s13 + $0x38] sm:$0xff]  ;;  %s1918_s13 = sshll.u32 %s2396_s12, 7  ;;  %s2273_s12 = smov [#allocation12]  }
 0x1d7   : > { %v1382_v22 = vsel %vm1346_vm8, %v1376_v17, %v1380_v18  ;;  %s3104_s30 = scalar_lea.hbm %s3153_s5, %s1918_s13  ;;  %s2186_s16 = sshll.u32 %s2273_s12, 4  ;;  %s2187_s16 = int_to_ptr.vmem [resolvable:$false] %s2186_s16 }
 0x1d8   : > { %v1387_v23 = vsel %vm3016_vm6, %v1385_v21, %v1382_v22  ;;  %v1570_v21 = vstv %s3054_s27  ;;  %s2188_s17 = scalar_lea.vmem %s2187_s16, 256  ;;  %p2189_p5 = scmp.lt.s32.totalorder %s3106_s11, %s2187_s16 }
 0x1d9   : > { %v1403_v27 = vadd.f32 %v1402_v13, %v1387_v23  ;;  %p2190_p1 = scmp.lt.s32.totalorder %s2188_s17, %s2182_s14 }
 0x1db   : > { %v1415_v29 = vrot.slane %v1403_v27, %v2641_v44  ;;  %v1419_v30 = vrot.slane %v1403_v27, %v2645_v46  ;;  %v1465_v32 = vrot.slane %v1403_v27, %v2653_v50  ;;  %v1469_v35 = vrot.slane %v1403_v27, %v2655_v51  ;;  %p2191_p3 = por %p2190_p1, %p2189_p5 }
 0x1dc   : > { %v1491_v37 = vrot.slane %v1403_v27, %v2657_v52  ;;  %v1495_v39 = vrot.slane %v1403_v27, %v2659_v53  ;;  %v1439_v40 = vrot.slane %v1403_v27, %v2649_v48  ;;  %v1443_v41 = vrot.slane %v1403_v27, %v2651_v49 }
 0x1dd   : > { %v1425_v43 = vrot.slane %v1415_v29, %v2641_v44  ;;  %v1429_v1 = vrot.slane %v1419_v30, %v2641_v44  ;;  %v1475_v33 = vrot.slane %v1465_v32, %v2653_v50  ;;  %v1479_v38 = vrot.slane %v1469_v35, %v2653_v50  ;;  %p2192_p7 = pnand %p2191_p3, %p2185_p2 }
 0x1de   : > { %v1449_v55 = vrot.slane %v1439_v40, %v2649_v48  ;;  %v1453_v56 = vrot.slane %v1443_v41, %v2649_v48  ;;  %v1501_v45 = vrot.slane %v1491_v37, %v2657_v52  ;;  %v1505_v58 = vrot.slane %v1495_v39, %v2657_v52 }
 0x1df   : > { %v1430_v42 = vmul.f32 %v1425_v43, %v1409_v20  ;;  %v1431_v57 = vmul.f32 %v1429_v1, %v1409_v20  ;;  %v1480_v62 = vmul.f32 %v1475_v33, %v1460_v31  ;;  %v1481_v0 = vmul.f32 %v1479_v38, %v1460_v31  ;;  %v1606_v38 = vpop.permute.xlu1 %1605 }
 0x1e0   : > { %v1454_v47 = vmul.f32 %v1449_v55, %v1434_v36  ;;  %v1455_v59 = vmul.f32 %v1453_v56, %v1434_v36  ;;  %v1506_v5 = vmul.f32 %v1501_v45, %v1486_v60  ;;  %v1507_v6 = vmul.f32 %v1505_v58, %v1486_v60  ;;  %v1581_v55 = vpop.permute.xlu0 %1580 }
 0x1e1   : > { %v1569_v29 = vsel %vm1567_vm11, %v1568_v8, %v1566_v16 }
 0x1e2   : > { %v1456_v2 = vadd.f32 %v1454_v47, %v1430_v42  ;;  %v1457_v4 = vadd.f32 %v1455_v59, %v1431_v57  ;;  %v1571_v35 = vsel %vm3069_vm12, %v1569_v29, %v1570_v21 }
 0x1e3   : > { %v1574_v25 = vmul.f32 %v1909_v26, %v1571_v35 }
 0x1e4   : > { %v1482_v7 = vadd.f32 %v1480_v62, %v1456_v2  ;;  %v1483_v9 = vadd.f32 %v1481_v0, %v1457_v4  ;;  %v1632_v0 = vpop.permute.xlu1 %1631 }
 0x1e6   : > { %v1508_v11 = vadd.f32 %v1506_v5, %v1482_v7  ;;  %v1509_v12 = vadd.f32 %v1507_v6, %v1483_v9 }
 0x1e8   : > { %v1523_v14 = vcombine.low %v1508_v11, %v1509_v12  ;;  %v1542_v13 = vmul.f32 0.0, %v1508_v11  ;;  %v1543_v20 = vmul.f32 0.0, %v1509_v12 }
 0x1ea   : > { %v1525_v17 = vsub.f32 %v1403_v27, %v1523_v14  ;;  %v1535_v18 = vsub.f32 %v2709_v34, %v1523_v14  ;;  %v1544_v27 = vadd.f32 %v1542_v13, %v2709_v34  ;;  %v1545_v32 = vadd.f32 %v1543_v20, %v2722_v54 }
 0x1ec   : > { %v1527_v22 = vmul.f32 %v1526_v15, %v1525_v17  ;;  %v1536_v23 = vmul.f32 %v1535_v18, %v1534_v63  ;;  %v1557_v36 = vcombine.low %v1544_v27, %v1545_v32 }
 0x1ee   : > { %v1529_v30 = vcombine.high %v1527_v22, %v1527_v22  ;;  %v1538_v31 = vcombine.high %v1536_v23, %v1536_v23  ;;  %v1531_v37 = vadd.f32 %v1527_v22, %v1508_v11  ;;  %v1540_v40 = vadd.f32 %v1536_v23, %v1508_v11 }
 0x1f0   : > { %v1532_v39 = vadd.f32 %v1529_v30, %v1509_v12  ;;  %v1541_v41 = vadd.f32 %v1538_v31, %v1509_v12 }
 0x1f2   : > { %v1548_v43 = vcombine.low %v1540_v40, %v1541_v41  ;;  %v1552_v1 = vcombine.low %v1531_v37, %v1532_v39 }
 0x1f4   : > { %v1554_v33 = vsel %vm1518_vm14, %v1548_v43, %v1552_v1 }
 0x1f5   : > { %v1559_v34 = vsel %vm3069_vm12, %v1557_v36, %v1554_v33 }
 0x1f6   : > { %v1575_v54 = vadd.f32 %v1574_v25, %v1559_v34 }
 0x1f8   : > { %v1611_v56 = vrot.slane %v1575_v54, %v2649_v48  ;;  %v1615_v42 = vrot.slane %v1575_v54, %v2651_v49  ;;  %v1587_v57 = vrot.slane %v1575_v54, %v2641_v44  ;;  %v1591_v19 = vrot.slane %v1575_v54, %v2645_v46 }
 0x1f9   : > { %v1637_v45 = vrot.slane %v1575_v54, %v2653_v50  ;;  %v1641_v58 = vrot.slane %v1575_v54, %v2655_v51  ;;  %v1663_v47 = vrot.slane %v1575_v54, %v2657_v52  ;;  %v1667_v59 = vrot.slane %v1575_v54, %v2659_v53 }
 0x1fa   : > { %v1621_v60 = vrot.slane %v1611_v56, %v2649_v48  ;;  %v1625_v61 = vrot.slane %v1615_v42, %v2649_v48  ;;  %v1597_v62 = vrot.slane %v1587_v57, %v2641_v44  ;;  %v1601_v49 = vrot.slane %v1591_v19, %v2641_v44  ;;  %v1658_v48 = vpop.permute.xlu0 %1657 }
 0x1fb   : > { %v1647_v2 = vrot.slane %v1637_v45, %v2653_v50  ;;  %v1651_v46 = vrot.slane %v1641_v58, %v2653_v50  ;;  %v1673_v51 = vrot.slane %v1663_v47, %v2657_v52  ;;  %v1677_v4 = vrot.slane %v1667_v59, %v2657_v52 }
 0x1fc   : > { %v1626_v53 = vmul.f32 %v1621_v60, %v1606_v38  ;;  %v1627_v5 = vmul.f32 %v1625_v61, %v1606_v38  ;;  %v1602_v6 = vmul.f32 %v1597_v62, %v1581_v55  ;;  %v1603_v7 = vmul.f32 %v1601_v49, %v1581_v55 }
 0x1fd   : > { %v1652_v44 = vmul.f32 %v1647_v2, %v1632_v0  ;;  %v1653_v3 = vmul.f32 %v1651_v46, %v1632_v0  ;;  %v1678_v50 = vmul.f32 %v1673_v51, %v1658_v48  ;;  %v1679_v12 = vmul.f32 %v1677_v4, %v1658_v48 }
 0x1fe   : > { %v1628_v9 = vadd.f32 %v1626_v53, %v1602_v6  ;;  %v1629_v24 = vadd.f32 %v1627_v5, %v1603_v7 }
 0x200   : > { %v1654_v10 = vadd.f32 %v1652_v44, %v1628_v9  ;;  %v1655_v11 = vadd.f32 %v1653_v3, %v1629_v24 }
 0x202   : > { %v1680_v14 = vadd.f32 %v1678_v50, %v1654_v10  ;;  %v1681_v52 = vadd.f32 %v1679_v12, %v1655_v11 }
 0x204   : > { %v1684_v63 = vcombine.low %v1680_v14, %v1681_v52 }
 0x206   : > { %1686 = vst [vmem:[%s340_s23] sm:$0xff] %v1684_v63 }
 0x207   : > { %2195 = shalt.err (!%p2192_p7)
}
 0x208   : > { %s2196_s10 = scalar_lea.hbm %s3104_s30, 128  ;;  %s2200_s26 = scalar_lea.hbm %s3153_s5, 256 }
 0x209   : > { %p2197_p8 = scmp.ne.s32.totalorder %s3104_s30, %s2196_s10  ;;  %p2201_p11 = scmp.lt.u32.totalorder %s3104_s30, %s3153_s5 }
 0x20a   : > { %p2202_p13 = scmp.lt.u32.totalorder %s2200_s26, %s2196_s10  ;;  %p2204_p9 = scmp.lt.u32.totalorder %s2196_s10, %s3104_s30 }
 0x20b   : > { %p2198_p12 = pnand %p2197_p8, %p3200_p0 }
 0x20c   : > { %p2203_p4 = por %p2202_p13, %p2201_p11 }
 0x20d   : > { %p2199_p6 = pneg %p2198_p12 }
 0x20e   : > { %p2205_p10 = por %p2204_p9, %p2203_p4 }
 0x210   : > { %p2206_p2 = pnand %p2205_p10, %p2199_p6 }
 0x212   : > { %2209 = shalt.err (!%p2206_p2)
}
 0x213   : > { %1933 = dma.vmem_to_hbm [thread:$0]  (%p3200_p0), %s3106_s11, 128, %s3104_s30, %s1688_s6  }
 0x214 PF: > { %s1714_s24 = sand.u32 1, %s2248_s18   ;;  %p3201_p5 = scmp.ne.s32.totalorder %s3172_s9, 0 }
 0x215   : > { %p3202_p1 = scmp.ge.s32.totalorder %s2260_s21, 2  ;;  %s1715_s28 = scalar_lea.sflag [#allocation4], %s1714_s24 }
 0x217   : > { %p1953_p3 = pnand %p3202_p1, %p3201_p5 }
 0x219   : > { %2243 = dma.done.wait (!%p1953_p3), %s1715_s28, 128  }
 0x21a   : > { %2245 = vsyncadd (!%p1953_p3), %s1715_s28, 4294967168  ;;  %s3203_s27 = sld [smem:[#allocation18_spill]]  ;;  %p23_p7 = scmp.ge.s32.totalorder %s2325_s22, 4  }
 0x21b   : > { %s3204_s18 = smov %s2252_s19  ;;  %s3205_s19 = smov %s2256_s20 }
 0x21c   : > { %s3207_s21 = smov %s2325_s22  ;;  %25 = sbr.rel (!%p23_p7) target bundleno = 12 (0xc), region = 126 }
 0x220   : > { %s3206_s20 = smov %s3203_s27 }
 0x223   :  { %1720 = vsyncpa [#allocation3], 1 }
 0x224   :  { %1722 = vsyncpa [#allocation3 + $0x1], 1 }
 0x225   :  { %1723 = vsyncpa [#allocation8], 1 }
 0x226   :  { %1725 = vsyncpa [#allocation8 + $0x1], 1 }
 0x227   :  { %1726 = vsyncpa [#allocation11], 1 }
 0x228   :  { %1728 = vsyncpa [#allocation11 + $0x1], 1 }
 0x229   :  { %1729 = vsyncpa [#allocation4], 1 }
 0x22a   :  { %1731 = vsyncpa [#allocation4 + $0x1], 1 }
 0x22b   :  { %1732 = vsyncpa [#allocation5], 1 }
 0x22c   :  { %1734 = vsyncpa [#allocation5 + $0x1], 1 }

</bundles_post_ra>
